<compile_context>
chip_gen: v7x
topology: tpu7x:2x2x1
jax: 0.10.0
libtpu: 0.0.40
codegen_flags: <defaults>
</compile_context>

<pallas_src>
import jax
import jax.numpy as jnp
from jax.experimental import pallas as pl
from jax.experimental.pallas import tpu as pltpu

HIDDEN = 512
LANE = 128
SUBLANE = 8


def _sampler_kernel(act_ref, vmask_ref, w1_ref, b1_ref,
                    w2_ref, b2_ref, w3_ref, b3_ref, w4_ref, b4_ref,
                    w5_ref, b5_ref,
                    out_ref, acc_ref):
    k = pl.program_id(0)
    tk = w1_ref.shape[0]

    @pl.when(k == 0)
    def _init():
        acc_ref[...] = jnp.zeros_like(acc_ref)

    # Layer-1 partial product: resident activation slice (N, tk) bf16 against the
    # streamed (tk, 512) bf16 weight block, accumulated in f32.
    start = pl.multiple_of(k * tk, LANE)
    a_tile = act_ref[:, pl.ds(start, tk)]
    acc_ref[...] += jnp.dot(a_tile, w1_ref[...],
                            preferred_element_type=jnp.float32)

    @pl.when(k == pl.num_programs(0) - 1)
    def _finalize():
        def relu_lin(h, w_ref, b_ref):
            # ReLU in f32, single bf16 cast, MXU dot with f32 accumulate.
            h = jnp.maximum(h, 0.0).astype(jnp.bfloat16)
            return jnp.dot(h, w_ref[...],
                           preferred_element_type=jnp.float32) + b_ref[...]

        h = acc_ref[...] + b1_ref[...]               # pre-ReLU layer-1 output
        h = relu_lin(h, w2_ref, b2_ref)
        h = relu_lin(h, w3_ref, b3_ref)
        h = relu_lin(h, w4_ref, b4_ref)
        o = relu_lin(h, w5_ref, b5_ref)              # (N, out_pad) f32, no ReLU on top

        # Numerically stable softplus; padded lanes (bias -1e30) become exactly 0.
        # (keep this stable form coupled with the -1e30 padding trick)
        o = jnp.log1p(jnp.exp(-jnp.abs(o))) + jnp.maximum(o, 0.0)

        # Per-row max normalization (row max is strictly positive).
        row_max = jnp.max(o, axis=-1, keepdims=True)
        o = o * pl.reciprocal(row_max, approx=True)

        # Gate out k-space columns that are already fully sampled.
        out_ref[...] = o * (1.0 - vmask_ref[...])


def _spec(shape, index_map, buffers=None):
    shape = tuple(int(s) for s in shape)
    if buffers is None:
        return pl.BlockSpec(shape, index_map)
    try:
        return pl.BlockSpec(shape, index_map, pipeline_mode=pl.Buffered(buffers))
    except (TypeError, AttributeError):
        return pl.BlockSpec(shape, index_map)


def _resident(shape):
    """Constant-index-map, single-buffered BlockSpec (block resident across the grid)."""
    zeros = (0,) * len(shape)
    return _spec(shape, lambda k, z=zeros: z, buffers=1)


def _vmem_capacity_bytes():
    try:
        return int(pltpu.get_tpu_info().vmem_capacity_bytes)
    except Exception:
        return 64 * 1024 * 1024          # conservative default (v7x per-core VMEM)


def _choose_tk(d_total, cap):
    """Largest multiple of 128 that divides d_total and is <= cap (else full dim)."""
    best = None
    t = LANE
    while t <= min(d_total, cap):
        if d_total % t == 0:
            best = t
        t += LANE
    return best if best is not None else d_total


def kspace_line_constrained_sampler(kspace, mask, kernel_params, out_chans, *,
                                    tk=None, w1_buffers=2):
    """kspace: (N, H, W, 4) f32; mask: (N, 1, H, W) f32 with entries in {0,1}.
    Returns (N, 1, 1, out_chans)."""
    N, H, W, C = kspace.shape
    hw = H * W
    d_total = (C + 1) * hw
    w1, b1, w2, b2, w3, b3, w4, b4, w5p, b5p = kernel_params
    hidden = w2.shape[0]
    out_pad = w5p.shape[1]
    assert out_chans == W, "only the line-constrained (out_chans == W) branch is implemented"
    assert w1.shape[0] == d_total

    vmem_cap = _vmem_capacity_bytes()
    big_vmem = vmem_cap >= 100 * 1024 * 1024          # 128 MiB parts (v5e / v6e)
    if tk is None:
        tk = _choose_tk(d_total, 8192 if big_vmem else 4096)
    assert d_total % tk == 0 and (tk % LANE == 0 or tk == d_total)
    num_k = d_total // tk

    # Pad the batch to a sublane multiple (>= 8); the weight stream is amortized
    # over all rows, so a bigger effective batch is nearly free.
    n_pad = max(SUBLANE, ((N + SUBLANE - 1) // SUBLANE) * SUBLANE)

    # Single flattened activation in the W1 row order:
    # kspace NHWC (h, w, c) flatten first, then mask (h, w).  Free reshapes.
    act = jnp.concatenate(
        [kspace.reshape(N, C * hw), mask.reshape(N, hw)], axis=1).astype(jnp.bfloat16)
    act = jnp.pad(act, ((0, n_pad - N), (0, 0)))

    # Line-constrained "already sampled" columns. NOTE: exact float equality is
    # only valid because mask entries are strictly {0,1} (same as the reference).
    vmask = (jnp.sum(mask[:, 0], axis=1) == float(H)).astype(jnp.float32)      # (N, W)
    vmask_p = jnp.pad(vmask, ((0, n_pad - N), (0, out_pad - out_chans)))

    inputs = (act, vmask_p, w1, b1, w2, b2, w3, b3, w4, b4, w5p, b5p)

    w1_extra = None if w1_buffers == 2 else w1_buffers   # Buffered(3) only on request
    in_specs = [
        _resident((n_pad, d_total)),                            # resident activation (bf16)
        _resident((n_pad, out_pad)),                            # vertical mask (lane padded)
        _spec((tk, hidden), lambda k: (k, 0), w1_extra),        # streamed W1 block
        _resident((1, hidden)),                                 # b1
        _resident((hidden, hidden)), _resident((1, hidden)),    # W2, b2
        _resident((hidden, hidden)), _resident((1, hidden)),    # W3, b3
        _resident((hidden, hidden)), _resident((1, hidden)),    # W4, b4
        _resident((hidden, out_pad)), _resident((1, out_pad)),  # W5, b5 (lane padded)
    ]

    # VMEM budget from actual tile sizes and buffer counts, capped per generation.
    resident_bytes = (n_pad * d_total * 2                       # activation (bf16)
                      + n_pad * out_pad * 4                     # vmask (f32)
                      + 3 * hidden * hidden * 2                 # W2..W4 (bf16)
                      + hidden * out_pad * 2                    # W5 (bf16)
                      + 4 * hidden * 4 + out_pad * 4)           # biases (f32)
    est = (max(2, w1_buffers) * tk * hidden * 2                 # streamed W1 buffers
           + resident_bytes                                     # single-buffered residents
           + 2 * n_pad * out_pad * 4                            # output (double-buffered)
           + n_pad * hidden * 4)                                # f32 accumulator scratch
    cap = (96 if big_vmem else 48) * 1024 * 1024
    vmem_limit = int(min(cap, max(32 * 1024 * 1024, int(1.25 * est) + (1 << 20))))

    flops = 2 * n_pad * (d_total * hidden + 3 * hidden * hidden + hidden * out_pad)
    bytes_accessed = sum(int(x.size) * x.dtype.itemsize for x in inputs) + n_pad * out_pad * 4
    cost = pl.CostEstimate(flops=flops, transcendentals=n_pad * out_pad,
                           bytes_accessed=bytes_accessed)

    # TODO(synk): on v7x the K weight stream could additionally be split across the two
    # TensorCores (leading 'parallel' axis / core_map with per-core partial accumulators
    # combined via VMEM_SHARED); a single "arbitrary" reduction axis is used here.
    out_p = pl.pallas_call(
        _sampler_kernel,
        out_shape=jax.ShapeDtypeStruct((n_pad, out_pad), jnp.float32),
        grid=(num_k,),
        in_specs=in_specs,
        out_specs=pl.BlockSpec((n_pad, out_pad), lambda k: (0, 0)),
        scratch_shapes=[pltpu.VMEM((n_pad, hidden), jnp.float32)],
        compiler_params=pltpu.CompilerParams(
            dimension_semantics=("arbitrary",),       # K reduction (accumulator) axis
            vmem_limit_bytes=vmem_limit),
        cost_estimate=cost,
    )(*inputs)

    # TODO(synk): only the out_chans == W vertical-mask branch is implemented
    # (no horizontal-mask branch, fixed_input, or with_uncertainty paths).
    return out_p[:N, :out_chans].reshape(N, 1, 1, out_chans)


def init_params(key, in_chans, out_chans):
    """PyTorch nn.Linear-style init; weights stored (in_features, out_features) in the
    module's original flatten order [kspace C0..C3 (each HxW), mask (HxW)]."""
    flatten_size = int(in_chans ** 2 * 5)
    dims = [(flatten_size, HIDDEN), (HIDDEN, HIDDEN), (HIDDEN, HIDDEN),
            (HIDDEN, HIDDEN), (HIDDEN, out_chans)]
    params = []
    for fan_in, fan_out in dims:
        key, kw, kb = jax.random.split(key, 3)
        bound = 1.0 / float(fan_in) ** 0.5
        w = jax.random.uniform(kw, (fan_in, fan_out), jnp.float32, -bound, bound)
        b = jax.random.uniform(kb, (1, fan_out), jnp.float32, -bound, bound)
        params += [w, b]
    return params


def prepare_params(torch_params, H, W):
    """Offline repack for the kernel:
       * reorder W1's kspace rows from the module's (c, h, w) flatten order to the NHWC
         (h, w, c) order and fold the mask rows into the same matrix so layer 1 is a
         single streamed act @ W1 product,
       * cast weights to bf16 (biases stay f32),
       * pad layer 5 to a multiple of 128 output lanes (zero weight columns and a -1e30
         bias so softplus of the padding is exactly 0)."""
    w1, b1, w2, b2, w3, b3, w4, b4, w5, b5 = torch_params
    hw = H * W
    hidden = w1.shape[1]
    w1_ksp = w1[:4 * hw]                       # rows ordered (c, h, w)
    w1_mask = w1[4 * hw:]                      # rows ordered (h, w)
    w1a = jnp.transpose(w1_ksp.reshape(4, hw, hidden), (1, 0, 2)).reshape(4 * hw, hidden)
    w1_full = jnp.concatenate([w1a, w1_mask], axis=0)   # matches [kspace NHWC, mask] act

    out_chans = w5.shape[1]
    out_pad = max(LANE, ((out_chans + LANE - 1) // LANE) * LANE)
    pad = out_pad - out_chans
    w5p = jnp.pad(w5, ((0, 0), (0, pad)))
    b5p = jnp.pad(b5, ((0, 0), (0, pad)), constant_values=-1e30)

    bf = lambda a: a.astype(jnp.bfloat16)
    f32 = lambda a: a.astype(jnp.float32)
    return (bf(w1_full), f32(b1), bf(w2), f32(b2), bf(w3), f32(b3),
            bf(w4), f32(b4), bf(w5p), f32(b5p))


def reference(kspace, mask, torch_params):
    """Pure-JAX mirror of the PyTorch forward (out_chans == W branch), using the same
    bf16-weight / f32-accumulate precision as the kernel."""
    N, H, W, _ = kspace.shape
    feat = jnp.concatenate([jnp.transpose(kspace, (0, 3, 1, 2)), mask],
                           axis=1).reshape(N, -1)
    w1, b1, w2, b2, w3, b3, w4, b4, w5, b5 = torch_params

    def lin(x, w, b):
        return jnp.dot(x.astype(jnp.bfloat16), w.astype(jnp.bfloat16),
                       preferred_element_type=jnp.float32) + b

    h = jax.nn.relu(lin(feat, w1, b1))
    h = jax.nn.relu(lin(h, w2, b2))
    h = jax.nn.relu(lin(h, w3, b3))
    h = jax.nn.relu(lin(h, w4, b4))
    o = jax.nn.softplus(lin(h, w5, b5))
    o = o / jnp.max(o, axis=1, keepdims=True)
    vmask = (mask[:, 0].sum(axis=1) == H).astype(jnp.float32)   # (N, W)
    return (o * (1.0 - vmask)).reshape(N, 1, 1, -1)


if __name__ == "__main__":
    N = 2
    in_chans = 16            # H == W == in_chans
    H = W = in_chans
    out_chans = W            # line-constrained: one score per k-space column

    key = jax.random.PRNGKey(0)
    k_param, k_ksp, k_cols = jax.random.split(key, 3)

    torch_params = init_params(k_param, in_chans, out_chans)
    kernel_params = prepare_params(torch_params, H, W)

    kspace = jax.random.normal(k_ksp, (N, H, W, 4), jnp.float32)
    # line-constrained mask: whole columns are either sampled or not
    cols = (jax.random.uniform(k_cols, (N, 1, 1, W)) < 0.3).astype(jnp.float32)
    mask = jnp.broadcast_to(cols, (N, 1, H, W))

    # tk=256 -> 5-step K reduction: exercises the accumulator / streamed-weight path.
    out = kspace_line_constrained_sampler(kspace, mask, kernel_params,
                                          out_chans, tk=256)
    out = jax.block_until_ready(out)

    ref = reference(kspace, mask, torch_params)
    assert out.shape == (N, 1, 1, out_chans), out.shape
    err = float(jnp.max(jnp.abs(out - ref)))
    # bf16 weights + approx reciprocal -> looser tolerance than a pure-f32 check
    assert jnp.allclose(out, ref, atol=1e-2, rtol=1e-2), err
    print("KERNEL_OK")
</pallas_src>

<mosaic_0001>
module attributes {stable_mosaic.version = 11 : i64} {
  func.func @_sampler_kernel(%arg0: i32, %arg1: memref<8x1280xbf16, #tpu.memory_space<vmem>>, %arg2: memref<8x128xf32, #tpu.memory_space<vmem>>, %arg3: memref<256x512xbf16, #tpu.memory_space<vmem>>, %arg4: memref<1x512xf32, #tpu.memory_space<vmem>>, %arg5: memref<512x512xbf16, #tpu.memory_space<vmem>>, %arg6: memref<1x512xf32, #tpu.memory_space<vmem>>, %arg7: memref<512x512xbf16, #tpu.memory_space<vmem>>, %arg8: memref<1x512xf32, #tpu.memory_space<vmem>>, %arg9: memref<512x512xbf16, #tpu.memory_space<vmem>>, %arg10: memref<1x512xf32, #tpu.memory_space<vmem>>, %arg11: memref<512x128xbf16, #tpu.memory_space<vmem>>, %arg12: memref<1x128xf32, #tpu.memory_space<vmem>>, %arg13: memref<8x128xf32, #tpu.memory_space<vmem>>, %arg14: memref<8x512xf32, #tpu.memory_space<vmem>>) attributes {dimension_semantics = [#tpu.dimension_semantics<arbitrary>], iteration_bounds = array<i64: 5>, scalar_prefetch = 0 : i64, scratch_operands = 1 : i64, tpu.core_type = #tpu.core_type<tc>, window_params = [{pipeline_mode = #tpu.pipeline_mode<synchronous>, transform_indices = @transform_0, window_bounds = array<i64: 8, 1280>}, {pipeline_mode = #tpu.pipeline_mode<synchronous>, transform_indices = @transform_1, window_bounds = array<i64: 8, 128>}, {transform_indices = @transform_2, window_bounds = array<i64: 256, 512>}, {pipeline_mode = #tpu.pipeline_mode<synchronous>, transform_indices = @transform_3, window_bounds = array<i64: 1, 512>}, {pipeline_mode = #tpu.pipeline_mode<synchronous>, transform_indices = @transform_4, window_bounds = array<i64: 512, 512>}, {pipeline_mode = #tpu.pipeline_mode<synchronous>, transform_indices = @transform_5, window_bounds = array<i64: 1, 512>}, {pipeline_mode = #tpu.pipeline_mode<synchronous>, transform_indices = @transform_6, window_bounds = array<i64: 512, 512>}, {pipeline_mode = #tpu.pipeline_mode<synchronous>, transform_indices = @transform_7, window_bounds = array<i64: 1, 512>}, {pipeline_mode = #tpu.pipeline_mode<synchronous>, transform_indices = @transform_8, window_bounds = array<i64: 512, 512>}, {pipeline_mode = #tpu.pipeline_mode<synchronous>, transform_indices = @transform_9, window_bounds = array<i64: 1, 512>}, {pipeline_mode = #tpu.pipeline_mode<synchronous>, transform_indices = @transform_10, window_bounds = array<i64: 512, 128>}, {pipeline_mode = #tpu.pipeline_mode<synchronous>, transform_indices = @transform_11, window_bounds = array<i64: 1, 128>}, {pipeline_mode = #tpu.pipeline_mode<synchronous>, transform_indices = @transform_12, window_bounds = array<i64: 8, 128>}]} {
    %c0_i32 = arith.constant 0 : i32
    %0 = arith.cmpi eq, %arg0, %c0_i32 : i32
    %1 = arith.extui %0 : i1 to i32
    %c0_i32_0 = arith.constant 0 : i32
    %2 = arith.cmpi ne, %1, %c0_i32_0 : i32
    scf.if %2 {
      %cst_8 = arith.constant 0.000000e+00 : f32
      %15 = vector.broadcast %cst_8 : f32 to vector<8x512xf32>
      %c0_9 = arith.constant 0 : index
      %c0_10 = arith.constant 0 : index
      %16 = vector.load %arg14[%c0_9, %c0_10] : memref<8x512xf32, #tpu.memory_space<vmem>>, vector<8x512xf32>
      tpu.vector_store %arg14[%c0_9, %c0_10], %15 {strides = array<i32>} : memref<8x512xf32, #tpu.memory_space<vmem>>, vector<8x512xf32>,
    } else {
    }
    %c256_i32 = arith.constant 256 : i32
    %3 = arith.muli %arg0, %c256_i32 : i32
    %4 = tpu.assume_multiple %3, 128 : i32
    %c0 = arith.constant 0 : index
    %5 = arith.index_cast %4 : i32 to index
    %6 = vector.load %arg1[%c0, %5] : memref<8x1280xbf16, #tpu.memory_space<vmem>>, vector<8x256xbf16>
    %c0_1 = arith.constant 0 : index
    %c0_2 = arith.constant 0 : index
    %7 = vector.load %arg14[%c0_1, %c0_2] : memref<8x512xf32, #tpu.memory_space<vmem>>, vector<8x512xf32>
    %c0_3 = arith.constant 0 : index
    %c0_4 = arith.constant 0 : index
    %8 = vector.load %arg3[%c0_3, %c0_4] : memref<256x512xbf16, #tpu.memory_space<vmem>>, vector<256x512xbf16>
    %cst = arith.constant dense<0.000000e+00> : vector<8x512xf32>
    %9 = tpu.matmul %6, %8, %cst {dimension_numbers = #tpu.dot_dimension_numbers<[1], [0], [0], [1], [0, 0, 1, 1], [], []>} : vector<8x256xbf16>, vector<256x512xbf16>, vector<8x512xf32> -> vector<8x512xf32>
    %10 = arith.addf %7, %9 : vector<8x512xf32>
    %c0_5 = arith.constant 0 : index
    %c0_6 = arith.constant 0 : index
    %11 = vector.load %arg14[%c0_5, %c0_6] : memref<8x512xf32, #tpu.memory_space<vmem>>, vector<8x512xf32>
    tpu.vector_store %arg14[%c0_5, %c0_6], %10 {strides = array<i32>} : memref<8x512xf32, #tpu.memory_space<vmem>>, vector<8x512xf32>,
    %c4_i32 = arith.constant 4 : i32
    %12 = arith.cmpi eq, %arg0, %c4_i32 : i32
    %13 = arith.extui %12 : i1 to i32
    %c0_i32_7 = arith.constant 0 : i32
    %14 = arith.cmpi ne, %13, %c0_i32_7 : i32
    scf.if %14 {
      %c0_8 = arith.constant 0 : index
      %c0_9 = arith.constant 0 : index
      %15 = vector.load %arg14[%c0_8, %c0_9] : memref<8x512xf32, #tpu.memory_space<vmem>>, vector<8x512xf32>
      %c0_10 = arith.constant 0 : index
      %c0_11 = arith.constant 0 : index
      %16 = vector.load %arg4[%c0_10, %c0_11] : memref<1x512xf32, #tpu.memory_space<vmem>>, vector<1x512xf32>
      %17 = vector.broadcast %16 : vector<1x512xf32> to vector<8x512xf32>
      %18 = arith.addf %15, %17 : vector<8x512xf32>
      %cst_12 = arith.constant 0.000000e+00 : f32
      %19 = vector.broadcast %cst_12 : f32 to vector<8x512xf32>
      %20 = arith.maximumf %18, %19 : vector<8x512xf32>
      %21 = arith.truncf %20 : vector<8x512xf32> to vector<8x512xbf16>
      %c0_13 = arith.constant 0 : index
      %c0_14 = arith.constant 0 : index
      %22 = vector.load %arg5[%c0_13, %c0_14] : memref<512x512xbf16, #tpu.memory_space<vmem>>, vector<512x512xbf16>
      %cst_15 = arith.constant dense<0.000000e+00> : vector<8x512xf32>
      %23 = tpu.matmul %21, %22, %cst_15 {dimension_numbers = #tpu.dot_dimension_numbers<[1], [0], [0], [1], [0, 0, 1, 1], [], []>} : vector<8x512xbf16>, vector<512x512xbf16>, vector<8x512xf32> -> vector<8x512xf32>
      %c0_16 = arith.constant 0 : index
      %c0_17 = arith.constant 0 : index
      %24 = vector.load %arg6[%c0_16, %c0_17] : memref<1x512xf32, #tpu.memory_space<vmem>>, vector<1x512xf32>
      %25 = vector.broadcast %24 : vector<1x512xf32> to vector<8x512xf32>
      %26 = arith.addf %23, %25 : vector<8x512xf32>
      %cst_18 = arith.constant 0.000000e+00 : f32
      %27 = vector.broadcast %cst_18 : f32 to vector<8x512xf32>
      %28 = arith.maximumf %26, %27 : vector<8x512xf32>
      %29 = arith.truncf %28 : vector<8x512xf32> to vector<8x512xbf16>
      %c0_19 = arith.constant 0 : index
      %c0_20 = arith.constant 0 : index
      %30 = vector.load %arg7[%c0_19, %c0_20] : memref<512x512xbf16, #tpu.memory_space<vmem>>, vector<512x512xbf16>
      %cst_21 = arith.constant dense<0.000000e+00> : vector<8x512xf32>
      %31 = tpu.matmul %29, %30, %cst_21 {dimension_numbers = #tpu.dot_dimension_numbers<[1], [0], [0], [1], [0, 0, 1, 1], [], []>} : vector<8x512xbf16>, vector<512x512xbf16>, vector<8x512xf32> -> vector<8x512xf32>
      %c0_22 = arith.constant 0 : index
      %c0_23 = arith.constant 0 : index
      %32 = vector.load %arg8[%c0_22, %c0_23] : memref<1x512xf32, #tpu.memory_space<vmem>>, vector<1x512xf32>
      %33 = vector.broadcast %32 : vector<1x512xf32> to vector<8x512xf32>
      %34 = arith.addf %31, %33 : vector<8x512xf32>
      %cst_24 = arith.constant 0.000000e+00 : f32
      %35 = vector.broadcast %cst_24 : f32 to vector<8x512xf32>
      %36 = arith.maximumf %34, %35 : vector<8x512xf32>
      %37 = arith.truncf %36 : vector<8x512xf32> to vector<8x512xbf16>
      %c0_25 = arith.constant 0 : index
      %c0_26 = arith.constant 0 : index
      %38 = vector.load %arg9[%c0_25, %c0_26] : memref<512x512xbf16, #tpu.memory_space<vmem>>, vector<512x512xbf16>
      %cst_27 = arith.constant dense<0.000000e+00> : vector<8x512xf32>
      %39 = tpu.matmul %37, %38, %cst_27 {dimension_numbers = #tpu.dot_dimension_numbers<[1], [0], [0], [1], [0, 0, 1, 1], [], []>} : vector<8x512xbf16>, vector<512x512xbf16>, vector<8x512xf32> -> vector<8x512xf32>
      %c0_28 = arith.constant 0 : index
      %c0_29 = arith.constant 0 : index
      %40 = vector.load %arg10[%c0_28, %c0_29] : memref<1x512xf32, #tpu.memory_space<vmem>>, vector<1x512xf32>
      %41 = vector.broadcast %40 : vector<1x512xf32> to vector<8x512xf32>
      %42 = arith.addf %39, %41 : vector<8x512xf32>
      %cst_30 = arith.constant 0.000000e+00 : f32
      %43 = vector.broadcast %cst_30 : f32 to vector<8x512xf32>
      %44 = arith.maximumf %42, %43 : vector<8x512xf32>
      %45 = arith.truncf %44 : vector<8x512xf32> to vector<8x512xbf16>
      %c0_31 = arith.constant 0 : index
      %c0_32 = arith.constant 0 : index
      %46 = vector.load %arg11[%c0_31, %c0_32] : memref<512x128xbf16, #tpu.memory_space<vmem>>, vector<512x128xbf16>
      %cst_33 = arith.constant dense<0.000000e+00> : vector<8x128xf32>
      %47 = tpu.matmul %45, %46, %cst_33 {dimension_numbers = #tpu.dot_dimension_numbers<[1], [0], [0], [1], [0, 0, 1, 1], [], []>} : vector<8x512xbf16>, vector<512x128xbf16>, vector<8x128xf32> -> vector<8x128xf32>
      %c0_34 = arith.constant 0 : index
      %c0_35 = arith.constant 0 : index
      %48 = vector.load %arg12[%c0_34, %c0_35] : memref<1x128xf32, #tpu.memory_space<vmem>>, vector<1x128xf32>
      %49 = vector.broadcast %48 : vector<1x128xf32> to vector<8x128xf32>
      %50 = arith.addf %47, %49 : vector<8x128xf32>
      %51 = math.absf %50 : vector<8x128xf32>
      %cst_36 = arith.constant 0.000000e+00 : f32
      %52 = vector.broadcast %cst_36 : f32 to vector<8x128xf32>
      %53 = arith.subf %52, %51 : vector<8x128xf32>
      %54 = math.exp %53 : vector<8x128xf32>
      %55 = math.log1p %54 : vector<8x128xf32>
      %cst_37 = arith.constant 0.000000e+00 : f32
      %56 = vector.broadcast %cst_37 : f32 to vector<8x128xf32>
      %57 = arith.maximumf %50, %56 : vector<8x128xf32>
      %58 = arith.addf %55, %57 : vector<8x128xf32>
      %cst_38 = arith.constant dense<0xFF800000> : vector<8xf32>
      %59 = vector.multi_reduction <maximumf>, %58, %cst_38 [1] : vector<8x128xf32> to vector<8xf32>
      %60 = vector.shape_cast %59 : vector<8xf32> to vector<8x1xf32>
      %61 = tpu.reciprocal %60 {approx = true} : vector<8x1xf32> -> vector<8x1xf32>
      %62 = vector.broadcast %61 : vector<8x1xf32> to vector<8x128xf32>
      %63 = arith.mulf %58, %62 : vector<8x128xf32>
      %c0_39 = arith.constant 0 : index
      %c0_40 = arith.constant 0 : index
      %64 = vector.load %arg2[%c0_39, %c0_40] : memref<8x128xf32, #tpu.memory_space<vmem>>, vector<8x128xf32>
      %cst_41 = arith.constant 1.000000e+00 : f32
      %65 = vector.broadcast %cst_41 : f32 to vector<8x128xf32>
      %66 = arith.subf %65, %64 : vector<8x128xf32>
      %67 = arith.mulf %63, %66 : vector<8x128xf32>
      %c0_42 = arith.constant 0 : index
      %c0_43 = arith.constant 0 : index
      %68 = vector.load %arg13[%c0_42, %c0_43] : memref<8x128xf32, #tpu.memory_space<vmem>>, vector<8x128xf32>
      tpu.vector_store %arg13[%c0_42, %c0_43], %67 {strides = array<i32>} : memref<8x128xf32, #tpu.memory_space<vmem>>, vector<8x128xf32>,
    } else {
    }
    return
  }
  func.func @transform_0(%arg0: i32) -> (i32, i32) {
    %c0_i32 = arith.constant 0 : i32
    %c0_i32_0 = arith.constant 0 : i32
    %c0_i32_1 = arith.constant 0 : i32
    return %c0_i32, %c0_i32_0 : i32, i32
  }
  func.func @transform_1(%arg0: i32) -> (i32, i32) {
    %c0_i32 = arith.constant 0 : i32
    %c0_i32_0 = arith.constant 0 : i32
    %c0_i32_1 = arith.constant 0 : i32
    return %c0_i32, %c0_i32_0 : i32, i32
  }
  func.func @transform_2(%arg0: i32) -> (i32, i32) {
    %c0_i32 = arith.constant 0 : i32
    %c0_i32_0 = arith.constant 0 : i32
    return %arg0, %c0_i32 : i32, i32
  }
  func.func @transform_3(%arg0: i32) -> (i32, i32) {
    %c0_i32 = arith.constant 0 : i32
    %c0_i32_0 = arith.constant 0 : i32
    %c0_i32_1 = arith.constant 0 : i32
    return %c0_i32, %c0_i32_0 : i32, i32
  }
  func.func @transform_4(%arg0: i32) -> (i32, i32) {
    %c0_i32 = arith.constant 0 : i32
    %c0_i32_0 = arith.constant 0 : i32
    %c0_i32_1 = arith.constant 0 : i32
    return %c0_i32, %c0_i32_0 : i32, i32
  }
  func.func @transform_5(%arg0: i32) -> (i32, i32) {
    %c0_i32 = arith.constant 0 : i32
    %c0_i32_0 = arith.constant 0 : i32
    %c0_i32_1 = arith.constant 0 : i32
    return %c0_i32, %c0_i32_0 : i32, i32
  }
  func.func @transform_6(%arg0: i32) -> (i32, i32) {
    %c0_i32 = arith.constant 0 : i32
    %c0_i32_0 = arith.constant 0 : i32
    %c0_i32_1 = arith.constant 0 : i32
    return %c0_i32, %c0_i32_0 : i32, i32
  }
  func.func @transform_7(%arg0: i32) -> (i32, i32) {
    %c0_i32 = arith.constant 0 : i32
    %c0_i32_0 = arith.constant 0 : i32
    %c0_i32_1 = arith.constant 0 : i32
    return %c0_i32, %c0_i32_0 : i32, i32
  }
  func.func @transform_8(%arg0: i32) -> (i32, i32) {
    %c0_i32 = arith.constant 0 : i32
    %c0_i32_0 = arith.constant 0 : i32
    %c0_i32_1 = arith.constant 0 : i32
    return %c0_i32, %c0_i32_0 : i32, i32
  }
  func.func @transform_9(%arg0: i32) -> (i32, i32) {
    %c0_i32 = arith.constant 0 : i32
    %c0_i32_0 = arith.constant 0 : i32
    %c0_i32_1 = arith.constant 0 : i32
    return %c0_i32, %c0_i32_0 : i32, i32
  }
  func.func @transform_10(%arg0: i32) -> (i32, i32) {
    %c0_i32 = arith.constant 0 : i32
    %c0_i32_0 = arith.constant 0 : i32
    %c0_i32_1 = arith.constant 0 : i32
    return %c0_i32, %c0_i32_0 : i32, i32
  }
  func.func @transform_11(%arg0: i32) -> (i32, i32) {
    %c0_i32 = arith.constant 0 : i32
    %c0_i32_0 = arith.constant 0 : i32
    %c0_i32_1 = arith.constant 0 : i32
    return %c0_i32, %c0_i32_0 : i32, i32
  }
  func.func @transform_12(%arg0: i32) -> (i32, i32) {
    %c0_i32 = arith.constant 0 : i32
    %c0_i32_0 = arith.constant 0 : i32
    %c0_i32_1 = arith.constant 0 : i32
    return %c0_i32, %c0_i32_0 : i32, i32
  }
}

</mosaic_0001>

<bundles_post_ra>
// kernel: tpu_custom_call.1
= control target key start
LH: loop header
LB: loop body
LE: loop exit
PB: predicated region body
PF: predicated region fallthrough
CT: control target
= control target key end

     0   :  { %s7057_s0 = inlined_call_operand.hbm [shape: bf16[8,1280], index: 0, kind: input, shape index: {}]   ;;  %s7058_s1 = inlined_call_operand.hbm [shape: f32[8,128], index: 1, kind: input, shape index: {}]   ;;  %s7059_s2 = inlined_call_operand.hbm [shape: bf16[1280,512], index: 2, kind: input, shape index: {}]   ;;  %s7060_s3 = inlined_call_operand.hbm [shape: f32[1,512], index: 3, kind: input, shape index: {}]   ;;  %s7061_s4 = inlined_call_operand.hbm [shape: bf16[512,512], index: 4, kind: input, shape index: {}]   ;;  %s7062_s5 = inlined_call_operand.hbm [shape: f32[1,512], index: 5, kind: input, shape index: {}]   ;;  %s7063_s6 = inlined_call_operand.hbm [shape: bf16[512,512], index: 6, kind: input, shape index: {}]   ;;  %s7064_s7 = inlined_call_operand.hbm [shape: f32[1,512], index: 7, kind: input, shape index: {}]   ;;  %s7065_s8 = inlined_call_operand.hbm [shape: bf16[512,512], index: 8, kind: input, shape index: {}]   ;;  %s7066_s9 = inlined_call_operand.hbm [shape: f32[1,512], index: 9, kind: input, shape index: {}]   ;;  %s7067_s10 = inlined_call_operand.hbm [shape: bf16[512,128], index: 10, kind: input, shape index: {}]   ;;  %s7068_s11 = inlined_call_operand.hbm [shape: f32[1,128], index: 11, kind: input, shape index: {}]   ;;  %s7069_s12 = inlined_call_operand.hbm [shape: f32[8,128], index: 12, kind: output, shape index: {}]  }
   0x1   :  { %7079 = sst [smem:[#allocation34_spill]] %s7057_s0 }
   0x2   :  { %7080 = sst [smem:[#allocation35_spill]] %s7058_s1 }
   0x3   :  { %7081 = sst [smem:[#allocation36_spill]] %s7059_s2 }
   0x4   :  { %7082 = sst [smem:[#allocation37_spill]] %s7069_s12 }
   0x5   :  { %17 = vsyncpa [#allocation4], 0 }
   0x6   :  { %18 = vsyncpa [#allocation7], 0 }
   0x7   :  { %19 = vsyncpa [#allocation11], 0 }
   0x8   :  { %20 = vsyncpa [#allocation14], 0 }
   0x9   :  { %21 = vsyncpa [#allocation17], 0 }
   0xa   :  { %22 = vsyncpa [#allocation20], 0 }
   0xb   :  { %23 = vsyncpa [#allocation5], 0  ;;  %s6515_s21 = smov 0   ;;  %s6517_s22 = smov 0  }
   0xc   :  { %s6519_s23 = smov 0   ;;  %s6521_s24 = smov 0  }
   0xd LB: > { %s6432_s25 = smov [#allocation3]   ;;  %s6536_s27 = sadd.s32 4294967295, %s6430_s24   ;;  %s6430_s24 = sphi %s6521_s24, %s7119_s24   ;;  %s6426_s23 = sphi %s6519_s23, %s7118_s23   ;;  %s6422_s22 = sphi %s6517_s22, %s7117_s22   ;;  %s6418_s21 = sphi %s6515_s21, %s7116_s21  }
   0xe   : > { %s325_s26 = sshll.u32 %s6432_s25, 4  ;;  %7083 = sst [smem:[#allocation32_spill]] %s6536_s27  ;;  %s326_s26 = int_to_ptr.vmem [resolvable:$true] %s325_s26 }
   0xf   : > { %p4523_p0 = scmp.ge.s32.totalorder %s6430_s24, 1  ;;  %p7070_p1 = scmp.eq.s32.totalorder %s6536_s27, 0 }
  0x10   : > { %p312_p2 = scmp.lt.s32.totalorder %s6430_s24, 6  ;;  %s6433_s29 = smov [#allocation6]  }
  0x11   : > { %s336_s30 = sshll.u32 %s6433_s29, 4  ;;  %s6434_s13 = smov [#allocation10]   ;;  %s6548_s30 = int_to_ptr.vmem [resolvable:$true] %s336_s30 }
  0x12   : > { %p6542_p4 = pnand %p4523_p0, %p312_p2  ;;  %s357_s14 = sshll.u32 %s6434_s13, 4  ;;  %s6556_s14 = int_to_ptr.vmem [resolvable:$true] %s357_s14 }
  0x13   : > { %s7087_s0 = sld [smem:[#allocation34_spill]] }
  0x14   : > { %s7084_s28 = scalar_select %p6542_p4, 1, 0 }
  0x15   : > { %p5176_p5 = pneg %p6542_p4 }
  0x16   : > { %7085 = sst [smem:[#allocation33_spill]] %s7084_s28 }
  0x17   : > { %p6552_p6 = pnand %p5176_p5, %p7070_p1 }
  0x19   : > { %s6000_s18 = scalar_lea.hbm %s7087_s0, 640  ;;  %p6566_p8 = pneg %p6552_p6 }
  0x1a   : > { %p6001_p7 = scmp.ne.s32.totalorder %s7087_s0, %s6000_s18  ;;  %p6007_p11 = scmp.lt.u32.totalorder %s6000_s18, %s7087_s0 }
  0x1c   : > { %p6003_p9 = pnand %p6566_p8, %p6001_p7 }
  0x1e   : > { %p6004_p10 = pneg %p6003_p9 }
  0x20   : > { %p6009_p12 = pnand %p6007_p11, %p6004_p10 }
  0x22   : > { %6012 = shalt.err (!%p6009_p12)
}
  0x23   : > { %s6013_s16 = scalar_lea.vmem %s326_s26, 640  ;;  %p6021_p5 = scmp.lt.s32.totalorder %s326_s26, %s326_s26 }
  0x24   : > { %p6014_p13 = scmp.ne.s32.totalorder %s326_s26, %s6013_s16  ;;  %p6022_p3 = scmp.lt.s32.totalorder %s6013_s16, %s6013_s16 }
  0x26   : > { %p6016_p0 = pnand %p6014_p13, %p6566_p8  ;;  %p6023_p1 = por %p6022_p3, %p6021_p5 }
  0x28   : > { %p6017_p2 = pneg %p6016_p0 }
  0x2a   : > { %p6024_p4 = pnand %p6023_p1, %p6017_p2 }
  0x2c   : > { %6027 = shalt.err (!%p6024_p4)
}
  0x2d   : > { %5179 = dma.hbm_to_vmem [thread:$0]  (!%p6552_p6), %s7087_s0, 640, %s326_s26, [#allocation4]  }
  0x2e   : > { %s7089_s1 = sld [smem:[#allocation35_spill]] }
  0x34   : > { %s6028_s29 = scalar_lea.hbm %s7089_s1, 128 }
  0x35   : > { %p6029_p7 = scmp.ne.s32.totalorder %s7089_s1, %s6028_s29  ;;  %p6035_p1 = scmp.lt.u32.totalorder %s6028_s29, %s7089_s1 }
  0x37   : > { %p6031_p9 = pnand %p6029_p7, %p6566_p8 }
  0x39   : > { %p6032_p3 = pneg %p6031_p9 }
  0x3b   : > { %p6037_p4 = pnand %p6035_p1, %p6032_p3 }
  0x3d   : > { %6040 = shalt.err (!%p6037_p4)
}
  0x3e   : > { %s6041_s26 = scalar_lea.vmem %s6548_s30, 128  ;;  %p6049_p13 = scmp.lt.s32.totalorder %s6548_s30, %s6548_s30 }
  0x3f   : > { %p6042_p10 = scmp.ne.s32.totalorder %s6548_s30, %s6041_s26  ;;  %p6050_p0 = scmp.lt.s32.totalorder %s6041_s26, %s6041_s26 }
  0x41   : > { %p6044_p11 = pnand %p6042_p10, %p6566_p8  ;;  %p6051_p2 = por %p6050_p0, %p6049_p13 }
  0x43   : > { %p6045_p12 = pneg %p6044_p11 }
  0x45   : > { %p6052_p5 = pnand %p6051_p2, %p6045_p12 }
  0x47   : > { %6055 = shalt.err (!%p6052_p5)
}
  0x48   : > { %5182 = dma.hbm_to_vmem [thread:$0]  (!%p6552_p6), %s7089_s1, 128, %s6548_s30, [#allocation7]  }
  0x49   : > { %s6056_s18 = scalar_lea.hbm %s7061_s4, 16384 }
  0x4a   : > { %p6057_p7 = scmp.ne.s32.totalorder %s7061_s4, %s6056_s18  ;;  %p6063_p1 = scmp.lt.u32.totalorder %s6056_s18, %s7061_s4 }
  0x4c   : > { %p6059_p9 = pnand %p6057_p7, %p6566_p8 }
  0x4e   : > { %p6060_p3 = pneg %p6059_p9 }
  0x50   : > { %p6065_p4 = pnand %p6063_p1, %p6060_p3 }
  0x52   : > { %6068 = shalt.err (!%p6065_p4)
}
  0x53   : > { %s6069_s30 = scalar_lea.vmem %s6556_s14, 16384  ;;  %p6077_p13 = scmp.lt.s32.totalorder %s6556_s14, %s6556_s14 }
  0x54   : > { %p6070_p10 = scmp.ne.s32.totalorder %s6556_s14, %s6069_s30  ;;  %p6078_p0 = scmp.lt.s32.totalorder %s6069_s30, %s6069_s30 }
  0x56   : > { %p6072_p11 = pnand %p6070_p10, %p6566_p8  ;;  %p6079_p2 = por %p6078_p0, %p6077_p13 }
  0x58   : > { %p6073_p12 = pneg %p6072_p11 }
  0x5a   : > { %p6080_p5 = pnand %p6079_p2, %p6073_p12 }
  0x5c   : > { %6083 = shalt.err (!%p6080_p5)
}
  0x5d   : > { %s6435_s26 = smov 256   ;;  %s6436_s12 = smov 16  }
  0x5e   : > { %5188 = dma.hbm_to_vmem [thread:$0]  (!%p6552_p6), %s7061_s4, 16384, %s6556_s14, [#allocation11], %s6435_s26, %s6435_s26, %s6436_s12  }
  0x5f   : > { %s6437_s19 = smov [#allocation13]   ;;  %s6438_s20 = smov [#allocation16]  }
  0x60   : > { %s381_s18 = sshll.u32 %s6437_s19, 4  ;;  %s405_s29 = sshll.u32 %s6438_s20, 4  ;;  %s382_s18 = int_to_ptr.vmem [resolvable:$true] %s381_s18  ;;  %s406_s29 = int_to_ptr.vmem [resolvable:$true] %s405_s29 }
  0x61   : > { %s6084_s30 = scalar_lea.hbm %s7063_s6, 16384 }
  0x62   : > { %p6085_p7 = scmp.ne.s32.totalorder %s7063_s6, %s6084_s30  ;;  %p6091_p1 = scmp.lt.u32.totalorder %s6084_s30, %s7063_s6 }
  0x64   : > { %p6087_p9 = pnand %p6085_p7, %p6566_p8 }
  0x66   : > { %p6088_p3 = pneg %p6087_p9 }
  0x68   : > { %p6093_p4 = pnand %p6091_p1, %p6088_p3 }
  0x6a   : > { %6096 = shalt.err (!%p6093_p4)
}
  0x6b   : > { %s6097_s14 = scalar_lea.vmem %s382_s18, 16384  ;;  %p6105_p13 = scmp.lt.s32.totalorder %s382_s18, %s382_s18 }
  0x6c   : > { %p6098_p10 = scmp.ne.s32.totalorder %s382_s18, %s6097_s14  ;;  %p6106_p0 = scmp.lt.s32.totalorder %s6097_s14, %s6097_s14 }
  0x6e   : > { %p6100_p11 = pnand %p6098_p10, %p6566_p8  ;;  %p6107_p2 = por %p6106_p0, %p6105_p13 }
  0x70   : > { %p6101_p12 = pneg %p6100_p11 }
  0x72   : > { %p6108_p5 = pnand %p6107_p2, %p6101_p12 }
  0x74   : > { %6111 = shalt.err (!%p6108_p5)
}
  0x75   : > { %5194 = dma.hbm_to_vmem [thread:$0]  (!%p6552_p6), %s7063_s6, 16384, %s382_s18, [#allocation14], %s6435_s26, %s6435_s26, %s6436_s12  }
  0x76   : > { %s6112_s28 = scalar_lea.hbm %s7065_s8, 16384 }
  0x77   : > { %p6113_p7 = scmp.ne.s32.totalorder %s7065_s8, %s6112_s28  ;;  %p6119_p1 = scmp.lt.u32.totalorder %s6112_s28, %s7065_s8 }
  0x79   : > { %p6115_p9 = pnand %p6113_p7, %p6566_p8 }
  0x7b   : > { %p6116_p3 = pneg %p6115_p9 }
  0x7d   : > { %p6121_p4 = pnand %p6119_p1, %p6116_p3 }
  0x7f   : > { %6124 = shalt.err (!%p6121_p4)
}
  0x80   : > { %s6125_s16 = scalar_lea.vmem %s406_s29, 16384  ;;  %p6133_p13 = scmp.lt.s32.totalorder %s406_s29, %s406_s29 }
  0x81   : > { %p6126_p10 = scmp.ne.s32.totalorder %s406_s29, %s6125_s16  ;;  %p6134_p0 = scmp.lt.s32.totalorder %s6125_s16, %s6125_s16 }
  0x83   : > { %p6128_p11 = pnand %p6126_p10, %p6566_p8  ;;  %p6135_p2 = por %p6134_p0, %p6133_p13 }
  0x85   : > { %p6129_p12 = pneg %p6128_p11 }
  0x87   : > { %p6136_p5 = pnand %p6135_p2, %p6129_p12 }
  0x89   : > { %6139 = shalt.err (!%p6136_p5)
}
  0x8a   : > { %5200 = dma.hbm_to_vmem [thread:$0]  (!%p6552_p6), %s7065_s8, 16384, %s406_s29, [#allocation17], %s6435_s26, %s6435_s26, %s6436_s12  }
  0x8b   : > { %s6439_s14 = smov [#allocation19]   ;;  %s6140_s27 = scalar_lea.hbm %s7067_s10, 4096 }
  0x8c   : > { %s429_s0 = sshll.u32 %s6439_s14, 4  ;;  %p6141_p7 = scmp.ne.s32.totalorder %s7067_s10, %s6140_s27  ;;  %s430_s0 = int_to_ptr.vmem [resolvable:$true] %s429_s0 }
  0x8d   : > { %p6147_p1 = scmp.lt.u32.totalorder %s6140_s27, %s7067_s10 }
  0x8e   : > { %p6143_p9 = pnand %p6141_p7, %p6566_p8 }
  0x90   : > { %p6144_p3 = pneg %p6143_p9 }
  0x92   : > { %p6149_p4 = pnand %p6147_p1, %p6144_p3 }
  0x94   : > { %6152 = shalt.err (!%p6149_p4)
}
  0x95   : > { %s6153_s29 = scalar_lea.vmem %s430_s0, 4096  ;;  %p6161_p13 = scmp.lt.s32.totalorder %s430_s0, %s430_s0 }
  0x96   : > { %p6154_p10 = scmp.ne.s32.totalorder %s430_s0, %s6153_s29  ;;  %p6162_p0 = scmp.lt.s32.totalorder %s6153_s29, %s6153_s29 }
  0x98   : > { %p6156_p11 = pnand %p6154_p10, %p6566_p8  ;;  %p6163_p2 = por %p6162_p0, %p6161_p13 }
  0x9a   : > { %p6157_p12 = pneg %p6156_p11 }
  0x9c   : > { %p6164_p5 = pnand %p6163_p2, %p6157_p12 }
  0x9e   : > { %6167 = shalt.err (!%p6164_p5)
}
  0x9f   : > { %s6440_s13 = smov 64   ;;  %s6441_s16 = smov 4  }
  0xa0   : > { %5206 = dma.hbm_to_vmem [thread:$0]  (!%p6552_p6), %s7067_s10, 4096, %s430_s0, [#allocation20], %s6440_s13, %s6440_s13, %s6441_s16  }
  0xa1   : > { %s6442_s14 = smov [#allocation9]   ;;  %s6443_s2 = smov [#allocation12]  }
  0xa2   : > { %s347_s1 = sshll.u32 %s6442_s14, 4  ;;  %s371_s27 = sshll.u32 %s6443_s2, 4  ;;  %s348_s1 = int_to_ptr.vmem [resolvable:$true] %s347_s1  ;;  %s6691_s27 = int_to_ptr.vmem [resolvable:$true] %s371_s27 }
  0xa3   : > { %s6168_s19 = scalar_lea.hbm %s7060_s3, 64 }
  0xa4   : > { %p6169_p7 = scmp.ne.s32.totalorder %s7060_s3, %s6168_s19  ;;  %p6175_p1 = scmp.lt.u32.totalorder %s6168_s19, %s7060_s3 }
  0xa6   : > { %p6171_p9 = pnand %p6169_p7, %p6566_p8 }
  0xa8   : > { %p6172_p3 = pneg %p6171_p9 }
  0xaa   : > { %p6177_p4 = pnand %p6175_p1, %p6172_p3 }
  0xac   : > { %6180 = shalt.err (!%p6177_p4)
}
  0xad   : > { %s6181_s13 = scalar_lea.vmem %s348_s1, 64  ;;  %p6189_p13 = scmp.lt.s32.totalorder %s348_s1, %s348_s1 }
  0xae   : > { %p6182_p10 = scmp.ne.s32.totalorder %s348_s1, %s6181_s13  ;;  %p6190_p0 = scmp.lt.s32.totalorder %s6181_s13, %s6181_s13 }
  0xb0   : > { %p6184_p11 = pnand %p6182_p10, %p6566_p8  ;;  %p6191_p2 = por %p6190_p0, %p6189_p13 }
  0xb2   : > { %p6185_p12 = pneg %p6184_p11 }
  0xb4   : > { %p6192_p5 = pnand %p6191_p2, %p6185_p12 }
  0xb6   : > { %6195 = shalt.err (!%p6192_p5)
}
  0xb7   : > { %5185 = dma.hbm_to_vmem [thread:$0]  (!%p6552_p6), %s7060_s3, 64, %s348_s1, [#allocation7]  }
  0xb8   : > { %s6196_s28 = scalar_lea.hbm %s7062_s5, 64 }
  0xb9   : > { %p6197_p7 = scmp.ne.s32.totalorder %s7062_s5, %s6196_s28  ;;  %p6203_p1 = scmp.lt.u32.totalorder %s6196_s28, %s7062_s5 }
  0xbb   : > { %p6199_p9 = pnand %p6197_p7, %p6566_p8 }
  0xbd   : > { %p6200_p3 = pneg %p6199_p9 }
  0xbf   : > { %p6205_p4 = pnand %p6203_p1, %p6200_p3 }
  0xc1   : > { %6208 = shalt.err (!%p6205_p4)
}
  0xc2   : > { %s6209_s1 = scalar_lea.vmem %s6691_s27, 64  ;;  %p6217_p13 = scmp.lt.s32.totalorder %s6691_s27, %s6691_s27 }
  0xc3   : > { %p6210_p10 = scmp.ne.s32.totalorder %s6691_s27, %s6209_s1  ;;  %p6218_p0 = scmp.lt.s32.totalorder %s6209_s1, %s6209_s1 }
  0xc5   : > { %p6212_p11 = pnand %p6210_p10, %p6566_p8  ;;  %p6219_p2 = por %p6218_p0, %p6217_p13 }
  0xc7   : > { %p6213_p12 = pneg %p6212_p11 }
  0xc9   : > { %p6220_p5 = pnand %p6219_p2, %p6213_p12 }
  0xcb   : > { %6223 = shalt.err (!%p6220_p5)
}
  0xcc   : > { %5191 = dma.hbm_to_vmem [thread:$0]  (!%p6552_p6), %s7062_s5, 64, %s6691_s27, [#allocation11]  }
  0xcd   : > { %s6444_s13 = smov [#allocation15]   ;;  %s6445_s30 = smov [#allocation18]  }
  0xce   : > { %s395_s16 = sshll.u32 %s6444_s13, 4  ;;  %s419_s14 = sshll.u32 %s6445_s30, 4  ;;  %s396_s16 = int_to_ptr.vmem [resolvable:$true] %s395_s16  ;;  %s6734_s14 = int_to_ptr.vmem [resolvable:$true] %s419_s14 }
  0xcf   : > { %s6224_s17 = scalar_lea.hbm %s7064_s7, 64 }
  0xd0   : > { %p6225_p7 = scmp.ne.s32.totalorder %s7064_s7, %s6224_s17  ;;  %p6231_p1 = scmp.lt.u32.totalorder %s6224_s17, %s7064_s7 }
  0xd2   : > { %p6227_p9 = pnand %p6225_p7, %p6566_p8 }
  0xd4   : > { %p6228_p3 = pneg %p6227_p9 }
  0xd6   : > { %p6233_p4 = pnand %p6231_p1, %p6228_p3 }
  0xd8   : > { %6236 = shalt.err (!%p6233_p4)
}
  0xd9   : > { %s6237_s1 = scalar_lea.vmem %s396_s16, 64  ;;  %p6245_p13 = scmp.lt.s32.totalorder %s396_s16, %s396_s16 }
  0xda   : > { %p6238_p10 = scmp.ne.s32.totalorder %s396_s16, %s6237_s1  ;;  %p6246_p0 = scmp.lt.s32.totalorder %s6237_s1, %s6237_s1 }
  0xdc   : > { %p6240_p11 = pnand %p6238_p10, %p6566_p8  ;;  %p6247_p2 = por %p6246_p0, %p6245_p13 }
  0xde   : > { %p6241_p12 = pneg %p6240_p11 }
  0xe0   : > { %p6248_p5 = pnand %p6247_p2, %p6241_p12 }
  0xe2   : > { %6251 = shalt.err (!%p6248_p5)
}
  0xe3   : > { %5197 = dma.hbm_to_vmem [thread:$0]  (!%p6552_p6), %s7064_s7, 64, %s396_s16, [#allocation14]  }
  0xe4   : > { %s6252_s2 = scalar_lea.hbm %s7066_s9, 64 }
  0xe5   : > { %p6253_p7 = scmp.ne.s32.totalorder %s7066_s9, %s6252_s2  ;;  %p6259_p1 = scmp.lt.u32.totalorder %s6252_s2, %s7066_s9 }
  0xe7   : > { %p6255_p9 = pnand %p6253_p7, %p6566_p8 }
  0xe9   : > { %p6256_p3 = pneg %p6255_p9 }
  0xeb   : > { %p6261_p4 = pnand %p6259_p1, %p6256_p3 }
  0xed   : > { %6264 = shalt.err (!%p6261_p4)
}
  0xee   : > { %s6265_s16 = scalar_lea.vmem %s6734_s14, 64  ;;  %p6273_p13 = scmp.lt.s32.totalorder %s6734_s14, %s6734_s14 }
  0xef   : > { %p6266_p10 = scmp.ne.s32.totalorder %s6734_s14, %s6265_s16  ;;  %p6274_p0 = scmp.lt.s32.totalorder %s6265_s16, %s6265_s16 }
  0xf1   : > { %p6268_p11 = pnand %p6266_p10, %p6566_p8  ;;  %p6275_p2 = por %p6274_p0, %p6273_p13 }
  0xf3   : > { %p6269_p12 = pneg %p6268_p11 }
  0xf5   : > { %p6276_p5 = pnand %p6275_p2, %p6269_p12 }
  0xf7   : > { %6279 = shalt.err (!%p6276_p5)
}
  0xf8   : > { %5203 = dma.hbm_to_vmem [thread:$0]  (!%p6552_p6), %s7066_s9, 64, %s6734_s14, [#allocation17]  }
  0xf9   : > { %s6446_s1 = smov [#allocation21]   ;;  %s6280_s30 = scalar_lea.hbm %s7068_s11, 16 }
  0xfa   : > { %s443_s18 = sshll.u32 %s6446_s1, 4  ;;  %p6281_p7 = scmp.ne.s32.totalorder %s7068_s11, %s6280_s30  ;;  %s444_s18 = int_to_ptr.vmem [resolvable:$true] %s443_s18 }
  0xfb   : > { %p6287_p1 = scmp.lt.u32.totalorder %s6280_s30, %s7068_s11 }
  0xfc   : > { %p6283_p9 = pnand %p6281_p7, %p6566_p8 }
  0xfe   : > { %p6284_p3 = pneg %p6283_p9 }
 0x100   : > { %p6289_p4 = pnand %p6287_p1, %p6284_p3 }
 0x102   : > { %6292 = shalt.err (!%p6289_p4)
}
 0x103   : > { %s6293_s14 = scalar_lea.vmem %s444_s18, 16  ;;  %s6300_s20 = scalar_lea.vmem %s444_s18, 32 }
 0x104   : > { %p6294_p10 = scmp.ne.s32.totalorder %s444_s18, %s6293_s14  ;;  %p6301_p13 = scmp.lt.s32.totalorder %s444_s18, %s444_s18 }
 0x105   : > { %p6302_p0 = scmp.lt.s32.totalorder %s6300_s20, %s6293_s14 }
 0x106   : > { %p6296_p11 = pnand %p6294_p10, %p6566_p8 }
 0x107   : > { %p6303_p2 = por %p6302_p0, %p6301_p13 }
 0x108   : > { %p6297_p12 = pneg %p6296_p11 }
 0x10a   : > { %p6304_p5 = pnand %p6303_p2, %p6297_p12 }
 0x10c   : > { %6307 = shalt.err (!%p6304_p5)
}
 0x10d   : > { %s7090_s25 = sld [smem:[#allocation32_spill]]  ;;  %s6796_s27 = sadd.s32 1, %s6430_s24  }
 0x10e   : > { %5209 = dma.hbm_to_vmem [thread:$0]  (!%p6552_p6), %s7068_s11, 16, %s444_s18, [#allocation20]  }
 0x10f   : > { %s75_s15 = ssub.s32 %s6430_s24, %s6796_s27  ;;  %s78_s1 = sadd.s32 1, %s6426_s23 }
 0x110   : > { %p76_p8 = scmp.eq.s32.totalorder %s75_s15, 0  ;;  %p85_p7 = scmp.ne.s32.totalorder %s6426_s23, %s6422_s22 }
 0x111   : > { %p86_p9 = scmp.eq.s32.totalorder %s6430_s24, 0  ;;  %p91_p3 = scmp.ne.s32.totalorder %s6422_s22, %s6418_s21 }
 0x112   : > { %s6807_s0 = scalar_select %p76_p8, %s6426_s23, %s78_s1  }
 0x113   : > { %p87_p1 = por %p86_p9, %p85_p7  ;;  %p7091_p4 = scmp.eq.s32.totalorder %s7090_s25, 0 }
 0x114   : > { %p5225_p11 = scmp.lt.s32.totalorder %s6430_s24, 5  ;;  %s454_s30 = sand.u32 1, %s6430_s24  }
 0x115   : > { %p6811_p10 = por %p7091_p4, %p91_p3  ;;  %s456_s18 = sand.u32 1, %s6426_s23  }
 0x116   : > { %s4536_s2 = sshll.u32 %s456_s18, 9  ;;  %s5045_s28 = sshll.u32 %s6430_s24, 13 }
 0x117   : > { %s7093_s14 = sld [smem:[#allocation36_spill]]  ;;  %s458_s21 = scalar_lea.vmem [#allocation8], %s4536_s2 }
 0x118   : > { %s466_s16 = sshll.u32 %s458_s21, 4  ;;  %p6824_p6 = pnand %p5225_p11, %p87_p1  ;;  %s6828_s16 = int_to_ptr.vmem [resolvable:$true] %s466_s16 }
 0x119   : > { %s6830_s24 = scalar_lea.sflag [#allocation4], %s454_s30 }
 0x11a   : > { %p6310_p13 = pneg %p6824_p6 }
 0x11d   : > { %s6822_s20 = scalar_lea.hbm %s7093_s14, %s5045_s28  ;;  %s6313_s18 = scalar_lea.hbm %s7093_s14, 40960 }
 0x11e   : > { %s6308_s25 = scalar_lea.hbm %s6822_s20, 8192  ;;  %p6314_p5 = scmp.lt.u32.totalorder %s6822_s20, %s7093_s14 }
 0x11f   : > { %p6309_p12 = scmp.ne.s32.totalorder %s6822_s20, %s6308_s25  ;;  %p6315_p8 = scmp.lt.u32.totalorder %s6313_s18, %s6308_s25 }
 0x120   : > { %p6317_p9 = scmp.lt.u32.totalorder %s6308_s25, %s6822_s20 }
 0x121   : > { %p6311_p0 = pnand %p6310_p13, %p6309_p12  ;;  %p6316_p7 = por %p6315_p8, %p6314_p5 }
 0x123   : > { %p6312_p2 = pneg %p6311_p0  ;;  %p6318_p3 = por %p6317_p9, %p6316_p7 }
 0x125   : > { %p6319_p1 = pnand %p6318_p3, %p6312_p2 }
 0x127   : > { %6322 = shalt.err (!%p6319_p1)
}
 0x128   : > { %s6323_s30 = scalar_lea.vmem %s6828_s16, 8192  ;;  %s6447_s17 = smov [#allocation8]  }
 0x129   : > { %p6324_p4 = scmp.ne.s32.totalorder %s6828_s16, %s6323_s30  ;;  %s6328_s19 = sshll.u32 %s6447_s17, 4  ;;  %s6329_s19 = int_to_ptr.vmem [resolvable:$false] %s6328_s19 }
 0x12a   : > { %s6330_s21 = scalar_lea.vmem %s6329_s19, 16384  ;;  %p6331_p0 = scmp.lt.s32.totalorder %s6828_s16, %s6329_s19 }
 0x12b   : > { %p6326_p11 = pnand %p6324_p4, %p6310_p13  ;;  %p6332_p5 = scmp.lt.s32.totalorder %s6330_s21, %s6323_s30 }
 0x12d   : > { %p6327_p12 = pneg %p6326_p11  ;;  %p6333_p8 = por %p6332_p5, %p6331_p0 }
 0x12f   : > { %p6334_p7 = pnand %p6333_p8, %p6327_p12 }
 0x131   : > { %6337 = shalt.err (!%p6334_p7)
}
 0x132   : > { %5213 = dma.hbm_to_vmem [thread:$0]  (!%p6824_p6), %s6822_s20, 8192, %s6828_s16, %s6830_s24, %s6435_s26, %s6435_s26, %s6436_s12  }
 0x133   : > { %s7095_s25 = sld [smem:[#allocation33_spill]] }
 0x139   : > { %p7096_p13 = scmp.ne.s32.totalorder %s7095_s25, 0 }
 0x13a   : > { %s7097_s15 = sld [smem:[#allocation32_spill]] (!%p7096_p13) }
 0x13b   : > { %478 = sbr.rel (%p7096_p13) target bundleno = 1950 (0x79e), region = 68 }
 0x140   : > { %p7098_p2 = scmp.eq.s32.totalorder (!%p7096_p13), %s7097_s15, 0 }
 0x142   : > { %6381 = dma.done.wait (%p7098_p2), [#allocation4], 640   ;;  %p7099_p9 = pmov %p7098_p2 }
 0x143   : > { %p7100_p3 = pmov %p7098_p2 }
 0x144   : > { %6383 = vsyncadd (%p7099_p9), [#allocation4], 4294966656 }
 0x145   : > { %6385 = dma.done.wait (%p7100_p3), [#allocation7], 128   ;;  %p7101_p1 = pmov %p7098_p2 }
 0x146   : > { %s488_s29 = sand.u32 1, %s7097_s15   ;;  %s490_s26 = sand.u32 1, %s6422_s22  }
 0x147   : > { %6387 = vsyncadd (%p7101_p1), [#allocation7], 4294967168  ;;  %s4543_s12 = sshll.u32 %s490_s26, 9  ;;  %s489_s20 = scalar_lea.sflag [#allocation4], %s488_s29 }
 0x148   : > { %s6873_s16 = scalar_lea.vmem [#allocation8], %s4543_s12 }
 0x149   : > { %6389 = dma.done.wait (%p6811_p10), %s489_s20, 8192  }
 0x14a   : > { %6391 = vsyncadd (%p6811_p10), %s489_s20, 4294959104  ;;  %p7102_p6 = pmov %p7101_p1 }
 0x14b   : > { %p7103_p4 = pmov %p7101_p1 }
 0x14c   : > { %6393 = dma.done.wait (%p7102_p6), [#allocation7], 64  }
 0x14d   : > { %6395 = vsyncadd (%p7103_p4), [#allocation7], 4294967232  ;;  %p7104_p11 = pmov %p7101_p1 }
 0x14e   : > { %p7105_p12 = pmov %p7101_p1 }
 0x14f   : > { %6397 = dma.done.wait (%p7104_p11), [#allocation11], 16448  }
 0x150   : > { %6399 = vsyncadd (%p7105_p12), [#allocation11], 4294950848  ;;  %p7106_p0 = pmov %p7101_p1 }
 0x152   : > { %6401 = dma.done.wait (%p7106_p0), [#allocation14], 16448   ;;  %p7107_p5 = pmov %p7106_p0 }
 0x153   : > { %p7108_p10 = pmov %p7106_p0 }
 0x154   : > { %6403 = vsyncadd (%p7107_p5), [#allocation14], 4294950848 }
 0x155   : > { %6405 = dma.done.wait (%p7108_p10), [#allocation17], 16448   ;;  %p7109_p8 = pmov %p7106_p0 }
 0x156   : > { %p7110_p7 = pmov %p7106_p0 }
 0x157   : > { %6407 = vsyncadd (%p7109_p8), [#allocation17], 4294950848 }
 0x158   : > { %6409 = dma.done.wait (%p7110_p7), [#allocation20], 4112   ;;  %p7111_p13 = pmov %p7106_p0 }
 0x159   : > { %p7112_p2 = scmp.ne.s32.totalorder %s7097_s15, 0 }
 0x15a   : > { %6411 = vsyncadd (%p7111_p13), [#allocation20], 4294963184  ;;  %v6448_v0 = vmov (!%p7112_p2), 0.0  }
 0x15b   : > { %569 = sbr.rel (%p7112_p2) target bundleno = 354 (0x162), region = 120  ;;  %570 = vst [vmem:[#allocation2] sm:$0xff] (!%p7112_p2), %v6448_v0  ;;  %571 = vst [vmem:[#allocation2 + $0x8] sm:$0xff] (!%p7112_p2), %v6448_v0 }
 0x15c   : > { %572 = vst [vmem:[#allocation2 + $0x10] sm:$0xff] (!%p7112_p2), %v6448_v0  ;;  %573 = vst [vmem:[#allocation2 + $0x18] sm:$0xff] (!%p7112_p2), %v6448_v0 }
 0x162 PF: > { %v5288_v1 = vld [vmem:[%s6873_s16 + $0x4] ss:$16 sps:$4 sm:$0xff]   ;;  %v5290_v2 = vld [vmem:[%s6873_s16 + $0xc] ss:$16 sps:$4 sm:$0xff]   ;;  %v5292_v3 = vld [vmem:[%s6873_s16] ss:$16 sps:$4 sm:$0xff]  }
 0x163   : > { %975 = vmatprep.subr.bf16.mxu0 %v5288_v1  ;;  %v5293_v4 = vld [vmem:[%s6873_s16 + $0x8] ss:$16 sps:$4 sm:$0xff]   ;;  %1016 = vmatprep.subr.bf16.mxu1 %v5290_v2  ;;  %v5294_v5 = vld [vmem:[%s6873_s16 + $0x24] ss:$16 sps:$4 sm:$0xff]   ;;  %v5296_v6 = vld [vmem:[%s6873_s16 + $0x2c] ss:$16 sps:$4 sm:$0xff]  }
 0x164   : > { %976 = vmatpush1.bf16.msra.mxu0 %v5292_v3  ;;  %1017 = vmatpush1.bf16.msra.mxu1 %v5293_v4  ;;  %v5298_v7 = vld [vmem:[%s6873_s16 + $0x20] ss:$16 sps:$4 sm:$0xff]   ;;  %v5299_v8 = vld [vmem:[%s6873_s16 + $0x28] ss:$16 sps:$4 sm:$0xff]   ;;  %v5300_v9 = vld [vmem:[%s6873_s16 + $0x44] ss:$16 sps:$4 sm:$0xff]  }
 0x165   : > { %977 = vmatprep.subr.bf16.mxu0 %v5294_v5  ;;  %1018 = vmatprep.subr.bf16.mxu1 %v5296_v6  ;;  %v5302_v10 = vld [vmem:[%s6873_s16 + $0x4c] ss:$16 sps:$4 sm:$0xff]   ;;  %v5304_v11 = vld [vmem:[%s6873_s16 + $0x40] ss:$16 sps:$4 sm:$0xff]   ;;  %v5305_v12 = vld [vmem:[%s6873_s16 + $0x48] ss:$16 sps:$4 sm:$0xff]  }
 0x166   : > { %v5306_v13 = vld [vmem:[%s6873_s16 + $0x64] ss:$16 sps:$4 sm:$0xff]   ;;  %v5308_v14 = vld [vmem:[%s6873_s16 + $0x6c] ss:$16 sps:$4 sm:$0xff]   ;;  %v5310_v15 = vld [vmem:[%s6873_s16 + $0x60] ss:$16 sps:$4 sm:$0xff]  }
 0x167   : > { %v5311_v16 = vld [vmem:[%s6873_s16 + $0x68] ss:$16 sps:$4 sm:$0xff]   ;;  %v5312_v17 = vld [vmem:[%s6873_s16 + $0x84] ss:$16 sps:$4 sm:$0xff]   ;;  %v5314_v18 = vld [vmem:[%s6873_s16 + $0x8c] ss:$16 sps:$4 sm:$0xff]  }
 0x168   : > { %978 = vmatpush1.bf16.msra.mxu0 %v5298_v7  ;;  %1019 = vmatpush1.bf16.msra.mxu1 %v5299_v8  ;;  %v5316_v19 = vld [vmem:[%s6873_s16 + $0x80] ss:$16 sps:$4 sm:$0xff]   ;;  %v5317_v20 = vld [vmem:[%s6873_s16 + $0x88] ss:$16 sps:$4 sm:$0xff]   ;;  %v5318_v21 = vld [vmem:[%s6873_s16 + $0xa4] ss:$16 sps:$4 sm:$0xff]  }
 0x169   : > { %979 = vmatprep.subr.bf16.mxu0 %v5300_v9  ;;  %1020 = vmatprep.subr.bf16.mxu1 %v5302_v10  ;;  %v5320_v22 = vld [vmem:[%s6873_s16 + $0xac] ss:$16 sps:$4 sm:$0xff]   ;;  %v5322_v23 = vld [vmem:[%s6873_s16 + $0xa0] ss:$16 sps:$4 sm:$0xff]   ;;  %v5323_v24 = vld [vmem:[%s6873_s16 + $0xa8] ss:$16 sps:$4 sm:$0xff]  }
 0x16a   : > { %v5324_v25 = vld [vmem:[%s6873_s16 + $0xc4] ss:$16 sps:$4 sm:$0xff]   ;;  %v5326_v26 = vld [vmem:[%s6873_s16 + $0xcc] ss:$16 sps:$4 sm:$0xff]   ;;  %v5328_v27 = vld [vmem:[%s6873_s16 + $0xc0] ss:$16 sps:$4 sm:$0xff]  }
 0x16b   : > { %s7113_s13 = sld [smem:[#allocation32_spill]]  ;;  %v5329_v28 = vld [vmem:[%s6873_s16 + $0xc8] ss:$16 sps:$4 sm:$0xff]   ;;  %v5330_v29 = vld [vmem:[%s6873_s16 + $0xe4] ss:$16 sps:$4 sm:$0xff]  }
 0x16c   : > { %980 = vmatpush1.bf16.msra.mxu0 %v5304_v11  ;;  %1021 = vmatpush1.bf16.msra.mxu1 %v5305_v12  ;;  %v5332_v30 = vld [vmem:[%s6873_s16 + $0xec] ss:$16 sps:$4 sm:$0xff]   ;;  %v5334_v31 = vld [vmem:[%s6873_s16 + $0xe0] ss:$16 sps:$4 sm:$0xff]   ;;  %v5335_v32 = vld [vmem:[%s6873_s16 + $0xe8] ss:$16 sps:$4 sm:$0xff]  }
 0x16d   : > { %981 = vmatprep.subr.bf16.mxu0 %v5306_v13  ;;  %1022 = vmatprep.subr.bf16.mxu1 %v5308_v14  ;;  %v5336_v33 = vld [vmem:[%s6873_s16 + $0x104] ss:$16 sps:$4 sm:$0xff]   ;;  %v5338_v34 = vld [vmem:[%s6873_s16 + $0x10c] ss:$16 sps:$4 sm:$0xff]   ;;  %v5340_v35 = vld [vmem:[%s6873_s16 + $0x100] ss:$16 sps:$4 sm:$0xff]  }
 0x16e   : > { %v5341_v36 = vld [vmem:[%s6873_s16 + $0x108] ss:$16 sps:$4 sm:$0xff]   ;;  %v5342_v37 = vld [vmem:[%s6873_s16 + $0x124] ss:$16 sps:$4 sm:$0xff]   ;;  %v5344_v38 = vld [vmem:[%s6873_s16 + $0x12c] ss:$16 sps:$4 sm:$0xff]  }
 0x16f   : > { %v5346_v39 = vld [vmem:[%s6873_s16 + $0x120] ss:$16 sps:$4 sm:$0xff]   ;;  %v5347_v40 = vld [vmem:[%s6873_s16 + $0x128] ss:$16 sps:$4 sm:$0xff]   ;;  %v5348_v41 = vld [vmem:[%s6873_s16 + $0x144] ss:$16 sps:$4 sm:$0xff]  }
 0x170   : > { %982 = vmatpush1.bf16.msra.mxu0 %v5310_v15  ;;  %1023 = vmatpush1.bf16.msra.mxu1 %v5311_v16  ;;  %v5350_v42 = vld [vmem:[%s6873_s16 + $0x14c] ss:$16 sps:$4 sm:$0xff]   ;;  %v5352_v43 = vld [vmem:[%s6873_s16 + $0x140] ss:$16 sps:$4 sm:$0xff]   ;;  %v5353_v44 = vld [vmem:[%s6873_s16 + $0x148] ss:$16 sps:$4 sm:$0xff]  }
 0x171   : > { %983 = vmatprep.subr.bf16.mxu0 %v5312_v17  ;;  %1024 = vmatprep.subr.bf16.mxu1 %v5314_v18  ;;  %s4554_s24 = sshll.u32 %s7113_s13, 8  ;;  %v5354_v45 = vld [vmem:[%s6873_s16 + $0x164] ss:$16 sps:$4 sm:$0xff]   ;;  %v5356_v46 = vld [vmem:[%s6873_s16 + $0x16c] ss:$16 sps:$4 sm:$0xff]   ;;  %p4622_p9 = scmp.ne.s32.totalorder %s7113_s13, 4 }
 0x172   : > { %s575_s1 = sshra.s32 %s4554_s24, 7  ;;  %v5358_v49 = vld [vmem:[%s6873_s16 + $0x160] ss:$16 sps:$4 sm:$0xff]   ;;  %v5359_v50 = vld [vmem:[%s6873_s16 + $0x168] ss:$16 sps:$4 sm:$0xff]  }
 0x173   : > { %s4555_s18 = sshll.u32 %s575_s1, 2  ;;  %v5360_v51 = vld [vmem:[%s6873_s16 + $0x184] ss:$16 sps:$4 sm:$0xff]   ;;  %v5362_v52 = vld [vmem:[%s6873_s16 + $0x18c] ss:$16 sps:$4 sm:$0xff]  }
 0x174   : > { %984 = vmatpush1.bf16.msra.mxu0 %v5316_v19  ;;  %1025 = vmatpush1.bf16.msra.mxu1 %v5317_v20  ;;  %s578_s2 = scalar_lea.vmem [#allocation3], %s4555_s18  ;;  %v5364_v53 = vld [vmem:[%s6873_s16 + $0x180] ss:$16 sps:$4 sm:$0xff]   ;;  %v5365_v54 = vld [vmem:[%s6873_s16 + $0x188] ss:$16 sps:$4 sm:$0xff]  }
 0x175   : > { %985 = vmatprep.subr.bf16.mxu0 %v5318_v21  ;;  %1026 = vmatprep.subr.bf16.mxu1 %v5320_v22  ;;  %v579_v47 = vld [vmem:[%s578_s2] sm:$0xff]  ;;  %v5368_v56 = vld [vmem:[%s6873_s16 + $0x1ac] ss:$16 sps:$4 sm:$0xff]   ;;  %v5371_v58 = vld [vmem:[%s6873_s16 + $0x1a8] ss:$16 sps:$4 sm:$0xff]  }
 0x176   : > { %v4557_v48 = vcombine.high %v579_v47, %v579_v47  ;;  %v5366_v55 = vld [vmem:[%s6873_s16 + $0x1a4] ss:$16 sps:$4 sm:$0xff]   ;;  %v5370_v57 = vld [vmem:[%s6873_s16 + $0x1a0] ss:$16 sps:$4 sm:$0xff]   ;;  %v5374_v60 = vld [vmem:[%s6873_s16 + $0x1cc] ss:$16 sps:$4 sm:$0xff]   ;;  %v4556_v3 = vcombine.low %v579_v47, %v579_v47 }
 0x177   : > { %v5372_v59 = vld [vmem:[%s6873_s16 + $0x1c4] ss:$16 sps:$4 sm:$0xff]   ;;  %v5376_v61 = vld [vmem:[%s6873_s16 + $0x1c0] ss:$16 sps:$4 sm:$0xff]   ;;  %v5377_v62 = vld [vmem:[%s6873_s16 + $0x1c8] ss:$16 sps:$4 sm:$0xff]  }
 0x178   : > { %986 = vmatpush1.bf16.msra.mxu0 %v5322_v23  ;;  %1027 = vmatpush1.bf16.msra.mxu1 %v5323_v24  ;;  %v5378_v63 = vld [vmem:[%s6873_s16 + $0x1e4] ss:$16 sps:$4 sm:$0xff]   ;;  %v5380_v0 = vld [vmem:[%s6873_s16 + $0x1ec] ss:$16 sps:$4 sm:$0xff]   ;;  %v5382_v1 = vld [vmem:[%s6873_s16 + $0x1e0] ss:$16 sps:$4 sm:$0xff]  }
 0x179   : > { %987 = vmatprep.subr.bf16.mxu0 %v5324_v25  ;;  %1028 = vmatprep.subr.bf16.mxu1 %v5326_v26  ;;  %v5383_v2 = vld [vmem:[%s6873_s16 + $0x1e8] ss:$16 sps:$4 sm:$0xff]   ;;  %v580_v4 = vld [vmem:[#allocation2] sm:$0xff]  ;;  %v582_v5 = vld [vmem:[#allocation2 + $0x10] sm:$0xff] }
 0x17a   : > { %1007 = vmatprep.mubr.bf16.mxu0 %v4557_v48  ;;  %1048 = vmatprep.mubr.bf16.mxu1 %v4557_v48  ;;  %v581_v6 = vld [vmem:[#allocation2 + $0x8] sm:$0xff]  ;;  %v583_v7 = vld [vmem:[#allocation2 + $0x18] sm:$0xff]  ;;  %v5388_v21 = vld [vmem:[#allocation10 + $0xc] ss:$16 sps:$4 sm:$0xff] (!%p4622_p9)  }
 0x17b   : > { %v5386_v20 = vld [vmem:[#allocation10 + $0x4] ss:$16 sps:$4 sm:$0xff] (!%p4622_p9)   ;;  %v5390_v22 = vld [vmem:[#allocation10] ss:$16 sps:$4 sm:$0xff] (!%p4622_p9)   ;;  %v5391_v23 = vld [vmem:[#allocation10 + $0x8] ss:$16 sps:$4 sm:$0xff] (!%p4622_p9)  }
 0x17c   : > { %988 = vmatpush1.bf16.msra.mxu0 %v5328_v27  ;;  %1029 = vmatpush1.bf16.msra.mxu1 %v5329_v28  ;;  %v5392_v24 = vld [vmem:[#allocation10 + $0x24] ss:$16 sps:$4 sm:$0xff] (!%p4622_p9)   ;;  %v5394_v25 = vld [vmem:[#allocation10 + $0x2c] ss:$16 sps:$4 sm:$0xff] (!%p4622_p9)   ;;  %v5396_v26 = vld [vmem:[#allocation10 + $0x20] ss:$16 sps:$4 sm:$0xff] (!%p4622_p9)  }
 0x17d   : > { %989 = vmatprep.subr.bf16.mxu0 %v5330_v29  ;;  %1030 = vmatprep.subr.bf16.mxu1 %v5332_v30  ;;  %v5397_v27 = vld [vmem:[#allocation10 + $0x28] ss:$16 sps:$4 sm:$0xff] (!%p4622_p9)   ;;  %v5398_v28 = vld [vmem:[#allocation10 + $0x44] ss:$16 sps:$4 sm:$0xff] (!%p4622_p9)   ;;  %v5400_v29 = vld [vmem:[#allocation10 + $0x4c] ss:$16 sps:$4 sm:$0xff] (!%p4622_p9)  }
 0x17e   : > { %v5402_v30 = vld [vmem:[#allocation10 + $0x40] ss:$16 sps:$4 sm:$0xff] (!%p4622_p9)   ;;  %v5427_v47 = vld [vmem:[#allocation10 + $0xc8] ss:$16 sps:$4 sm:$0xff] (!%p4622_p9)   ;;  %v5428_v48 = vld [vmem:[#allocation10 + $0xe4] ss:$16 sps:$4 sm:$0xff] (!%p4622_p9)  }
 0x180   : > { %990 = vmatpush1.bf16.msra.mxu0 %v5334_v31  ;;  %1031 = vmatpush1.bf16.msra.mxu1 %v5335_v32  ;;  %v5403_v31 = vld [vmem:[#allocation10 + $0x48] ss:$16 sps:$4 sm:$0xff] (!%p4622_p9)   ;;  %v5404_v32 = vld [vmem:[#allocation10 + $0x64] ss:$16 sps:$4 sm:$0xff] (!%p4622_p9)  }
 0x181   : > { %991 = vmatprep.subr.bf16.mxu0 %v5336_v33  ;;  %1032 = vmatprep.subr.bf16.mxu1 %v5338_v34  ;;  %v5406_v33 = vld [vmem:[#allocation10 + $0x6c] ss:$16 sps:$4 sm:$0xff] (!%p4622_p9)   ;;  %v5408_v34 = vld [vmem:[#allocation10 + $0x60] ss:$16 sps:$4 sm:$0xff] (!%p4622_p9)  }
 0x184   : > { %992 = vmatpush1.bf16.msra.mxu0 %v5340_v35  ;;  %1033 = vmatpush1.bf16.msra.mxu1 %v5341_v36  ;;  %v5409_v35 = vld [vmem:[#allocation10 + $0x68] ss:$16 sps:$4 sm:$0xff] (!%p4622_p9)   ;;  %v5410_v36 = vld [vmem:[#allocation10 + $0x84] ss:$16 sps:$4 sm:$0xff] (!%p4622_p9)  }
 0x185   : > { %993 = vmatprep.subr.bf16.mxu0 %v5342_v37  ;;  %1034 = vmatprep.subr.bf16.mxu1 %v5344_v38  ;;  %v5412_v37 = vld [vmem:[#allocation10 + $0x8c] ss:$16 sps:$4 sm:$0xff] (!%p4622_p9)   ;;  %v5414_v38 = vld [vmem:[#allocation10 + $0x80] ss:$16 sps:$4 sm:$0xff] (!%p4622_p9)  }
 0x188   : > { %994 = vmatpush1.bf16.msra.mxu0 %v5346_v39  ;;  %1035 = vmatpush1.bf16.msra.mxu1 %v5347_v40  ;;  %v5415_v39 = vld [vmem:[#allocation10 + $0x88] ss:$16 sps:$4 sm:$0xff] (!%p4622_p9)   ;;  %v5416_v40 = vld [vmem:[#allocation10 + $0xa4] ss:$16 sps:$4 sm:$0xff] (!%p4622_p9)  }
 0x189   : > { %995 = vmatprep.subr.bf16.mxu0 %v5348_v41  ;;  %1036 = vmatprep.subr.bf16.mxu1 %v5350_v42  ;;  %v5418_v41 = vld [vmem:[#allocation10 + $0xac] ss:$16 sps:$4 sm:$0xff] (!%p4622_p9)   ;;  %v5420_v42 = vld [vmem:[#allocation10 + $0xa0] ss:$16 sps:$4 sm:$0xff] (!%p4622_p9)  }
 0x18c   : > { %996 = vmatpush1.bf16.msra.mxu0 %v5352_v43  ;;  %1037 = vmatpush1.bf16.msra.mxu1 %v5353_v44  ;;  %v5421_v43 = vld [vmem:[#allocation10 + $0xa8] ss:$16 sps:$4 sm:$0xff] (!%p4622_p9)   ;;  %v5422_v44 = vld [vmem:[#allocation10 + $0xc4] ss:$16 sps:$4 sm:$0xff] (!%p4622_p9)  }
 0x18d   : > { %997 = vmatprep.subr.bf16.mxu0 %v5354_v45  ;;  %1038 = vmatprep.subr.bf16.mxu1 %v5356_v46  ;;  %v5424_v45 = vld [vmem:[#allocation10 + $0xcc] ss:$16 sps:$4 sm:$0xff] (!%p4622_p9)   ;;  %v5426_v46 = vld [vmem:[#allocation10 + $0xc0] ss:$16 sps:$4 sm:$0xff] (!%p4622_p9)  }
 0x190   : > { %998 = vmatpush1.bf16.msra.mxu0 %v5358_v49  ;;  %1039 = vmatpush1.bf16.msra.mxu1 %v5359_v50  ;;  %v5430_v49 = vld [vmem:[#allocation10 + $0xec] ss:$16 sps:$4 sm:$0xff] (!%p4622_p9)   ;;  %v5432_v50 = vld [vmem:[#allocation10 + $0xe0] ss:$16 sps:$4 sm:$0xff] (!%p4622_p9)  }
 0x191   : > { %999 = vmatprep.subr.bf16.mxu0 %v5360_v51  ;;  %1040 = vmatprep.subr.bf16.mxu1 %v5362_v52  ;;  %v5433_v51 = vld [vmem:[#allocation10 + $0xe8] ss:$16 sps:$4 sm:$0xff] (!%p4622_p9)   ;;  %v5434_v52 = vld [vmem:[#allocation10 + $0x104] ss:$16 sps:$4 sm:$0xff] (!%p4622_p9)  }
 0x194   : > { %1000 = vmatpush1.bf16.msra.mxu0 %v5364_v53  ;;  %1041 = vmatpush1.bf16.msra.mxu1 %v5365_v54  ;;  %v5436_v53 = vld [vmem:[#allocation10 + $0x10c] ss:$16 sps:$4 sm:$0xff] (!%p4622_p9)   ;;  %v5438_v54 = vld [vmem:[#allocation10 + $0x100] ss:$16 sps:$4 sm:$0xff] (!%p4622_p9)  }
 0x195   : > { %1001 = vmatprep.subr.bf16.mxu0 %v5366_v55  ;;  %1042 = vmatprep.subr.bf16.mxu1 %v5368_v56  ;;  %v5439_v55 = vld [vmem:[#allocation10 + $0x108] ss:$16 sps:$4 sm:$0xff] (!%p4622_p9)   ;;  %v5440_v56 = vld [vmem:[#allocation10 + $0x124] ss:$16 sps:$4 sm:$0xff] (!%p4622_p9)  }
 0x198   : > { %1002 = vmatpush1.bf16.msra.mxu0 %v5370_v57  ;;  %1043 = vmatpush1.bf16.msra.mxu1 %v5371_v58  ;;  %v1075_v57 = vlaneseq (!%p4622_p9)  ;;  %v5442_v58 = vld [vmem:[#allocation10 + $0x12c] ss:$16 sps:$4 sm:$0xff] (!%p4622_p9)  }
 0x199   : > { %1003 = vmatprep.subr.bf16.mxu0 %v5372_v59  ;;  %1044 = vmatprep.subr.bf16.mxu1 %v5374_v60  ;;  %v5444_v59 = vld [vmem:[#allocation10 + $0x120] ss:$16 sps:$4 sm:$0xff] (!%p4622_p9)   ;;  %v5445_v60 = vld [vmem:[#allocation10 + $0x128] ss:$16 sps:$4 sm:$0xff] (!%p4622_p9)  }
 0x19c   : > { %1004 = vmatpush1.bf16.msra.mxu0 %v5376_v61  ;;  %1045 = vmatpush1.bf16.msra.mxu1 %v5377_v62  ;;  %v5446_v61 = vld [vmem:[#allocation10 + $0x144] ss:$16 sps:$4 sm:$0xff] (!%p4622_p9)   ;;  %v6967_v62 = vshrl.u32 (!%p4622_p9), %v1075_v57, 7  ;;  %v5517_v57 = vld [vmem:[#allocation10 + $0x2ac] ss:$16 sps:$4 sm:$0xff] (!%p4622_p9)  }
 0x19d   : > { %1005 = vmatprep.subr.bf16.mxu0 %v5378_v63  ;;  %1046 = vmatprep.subr.bf16.mxu1 %v5380_v0  ;;  %v5448_v63 = vld [vmem:[#allocation10 + $0x14c] ss:$16 sps:$4 sm:$0xff] (!%p4622_p9)   ;;  %v5450_v0 = vld [vmem:[#allocation10 + $0x140] ss:$16 sps:$4 sm:$0xff] (!%p4622_p9)  }
 0x1a0   : > { %1006 = vmatpush1.bf16.msra.mxu0 %v5382_v1  ;;  %1047 = vmatpush1.bf16.msra.mxu1 %v5383_v2  ;;  %v5451_v1 = vld [vmem:[#allocation10 + $0x148] ss:$16 sps:$4 sm:$0xff] (!%p4622_p9)   ;;  %v5452_v2 = vld [vmem:[#allocation10 + $0x164] ss:$16 sps:$4 sm:$0xff] (!%p4622_p9)  }
 0x1a1   : > { %1897 = vmatprep.subr.bf16.mxu0 (!%p4622_p9), %v5386_v20  ;;  %1979 = vmatprep.subr.bf16.mxu1 (!%p4622_p9), %v5388_v21  ;;  %v5468_v20 = vld [vmem:[#allocation10 + $0x1a0] ss:$16 sps:$4 sm:$0xff] (!%p4622_p9)   ;;  %v5469_v21 = vld [vmem:[#allocation10 + $0x1a8] ss:$16 sps:$4 sm:$0xff] (!%p4622_p9)  }
 0x1a3   : > { %1008 = vmatmul.mubr.bf16.vlgmr.msra.gmra.mrb[0].mxu0 %v4556_v3  ;;  %1049 = vmatmul.mubr.bf16.vlgmr.msra.gmra.mrb[0].mxu1 %v4556_v3  ;;  %v6970_v3 = vsub.s32 (!%p4622_p9), 1, %v6967_v62 }
 0x1a4   : > { %1898 = vmatpush1.bf16.msra.mxu0 (!%p4622_p9), %v5390_v22  ;;  %1980 = vmatpush1.bf16.msra.mxu1 (!%p4622_p9), %v5391_v23  ;;  %v5470_v23 = vld [vmem:[#allocation10 + $0x1c4] ss:$16 sps:$4 sm:$0xff] (!%p4622_p9)  }
 0x1a5   : > { %1899 = vmatprep.subr.bf16.mxu0 (!%p4622_p9), %v5392_v24  ;;  %1981 = vmatprep.subr.bf16.mxu1 (!%p4622_p9), %v5394_v25  ;;  %v5472_v25 = vld [vmem:[#allocation10 + $0x1cc] ss:$16 sps:$4 sm:$0xff] (!%p4622_p9)  }
 0x1a8   : > { %1900 = vmatpush1.bf16.msra.mxu0 (!%p4622_p9), %v5396_v26  ;;  %1982 = vmatpush1.bf16.msra.mxu1 (!%p4622_p9), %v5397_v27  ;;  %v5474_v26 = vld [vmem:[#allocation10 + $0x1c0] ss:$16 sps:$4 sm:$0xff] (!%p4622_p9)  }
 0x1a9   : > { %1901 = vmatprep.subr.bf16.mxu0 (!%p4622_p9), %v5398_v28  ;;  %1983 = vmatprep.subr.bf16.mxu1 (!%p4622_p9), %v5400_v29  ;;  %v5475_v28 = vld [vmem:[#allocation10 + $0x1c8] ss:$16 sps:$4 sm:$0xff] (!%p4622_p9)   ;;  %v5476_v29 = vld [vmem:[#allocation10 + $0x1e4] ss:$16 sps:$4 sm:$0xff] (!%p4622_p9)  }
 0x1ac   : > { %1902 = vmatpush1.bf16.msra.mxu0 (!%p4622_p9), %v5402_v30  ;;  %1984 = vmatpush1.bf16.msra.mxu1 (!%p4622_p9), %v5403_v31  ;;  %v5478_v30 = vld [vmem:[#allocation10 + $0x1ec] ss:$16 sps:$4 sm:$0xff] (!%p4622_p9)   ;;  %v5480_v31 = vld [vmem:[#allocation10 + $0x1e0] ss:$16 sps:$4 sm:$0xff] (!%p4622_p9)  }
 0x1ad   : > { %1903 = vmatprep.subr.bf16.mxu0 (!%p4622_p9), %v5404_v32  ;;  %1985 = vmatprep.subr.bf16.mxu1 (!%p4622_p9), %v5406_v33  ;;  %v5481_v33 = vld [vmem:[#allocation10 + $0x1e8] ss:$16 sps:$4 sm:$0xff] (!%p4622_p9)  }
 0x1b0   : > { %1904 = vmatpush1.bf16.msra.mxu0 (!%p4622_p9), %v5408_v34  ;;  %1986 = vmatpush1.bf16.msra.mxu1 (!%p4622_p9), %v5409_v35  ;;  %v5484_v34 = vld [vmem:[#allocation10 + $0x204] ss:$16 sps:$4 sm:$0xff] (!%p4622_p9)   ;;  %v5487_v35 = vld [vmem:[#allocation10 + $0x20c] ss:$16 sps:$4 sm:$0xff] (!%p4622_p9)  }
 0x1b1   : > { %1905 = vmatprep.subr.bf16.mxu0 (!%p4622_p9), %v5410_v36  ;;  %1987 = vmatprep.subr.bf16.mxu1 (!%p4622_p9), %v5412_v37  ;;  %v5482_v36 = vld [vmem:[#allocation10 + $0x200] ss:$16 sps:$4 sm:$0xff] (!%p4622_p9)  }
 0x1b4   : > { %1906 = vmatpush1.bf16.msra.mxu0 (!%p4622_p9), %v5414_v38  ;;  %1988 = vmatpush1.bf16.msra.mxu1 (!%p4622_p9), %v5415_v39  ;;  %v5485_v38 = vld [vmem:[#allocation10 + $0x208] ss:$16 sps:$4 sm:$0xff] (!%p4622_p9)   ;;  %v5490_v39 = vld [vmem:[#allocation10 + $0x224] ss:$16 sps:$4 sm:$0xff] (!%p4622_p9)  }
 0x1b5   : > { %1907 = vmatprep.subr.bf16.mxu0 (!%p4622_p9), %v5416_v40  ;;  %1989 = vmatprep.subr.bf16.mxu1 (!%p4622_p9), %v5418_v41  ;;  %v5493_v40 = vld [vmem:[#allocation10 + $0x22c] ss:$16 sps:$4 sm:$0xff] (!%p4622_p9)   ;;  %v5488_v41 = vld [vmem:[#allocation10 + $0x220] ss:$16 sps:$4 sm:$0xff] (!%p4622_p9)  }
 0x1b8   : > { %1908 = vmatpush1.bf16.msra.mxu0 (!%p4622_p9), %v5420_v42  ;;  %1990 = vmatpush1.bf16.msra.mxu1 (!%p4622_p9), %v5421_v43  ;;  %v5491_v42 = vld [vmem:[#allocation10 + $0x228] ss:$16 sps:$4 sm:$0xff] (!%p4622_p9)   ;;  %v5496_v43 = vld [vmem:[#allocation10 + $0x244] ss:$16 sps:$4 sm:$0xff] (!%p4622_p9)  }
 0x1b9   : > { %1909 = vmatprep.subr.bf16.mxu0 (!%p4622_p9), %v5422_v44  ;;  %1991 = vmatprep.subr.bf16.mxu1 (!%p4622_p9), %v5424_v45  ;;  %v5499_v44 = vld [vmem:[#allocation10 + $0x24c] ss:$16 sps:$4 sm:$0xff] (!%p4622_p9)   ;;  %v5494_v45 = vld [vmem:[#allocation10 + $0x240] ss:$16 sps:$4 sm:$0xff] (!%p4622_p9)  }
 0x1bc   : > { %1910 = vmatpush1.bf16.msra.mxu0 (!%p4622_p9), %v5426_v46  ;;  %1992 = vmatpush1.bf16.msra.mxu1 (!%p4622_p9), %v5427_v47  ;;  %v5497_v46 = vld [vmem:[#allocation10 + $0x248] ss:$16 sps:$4 sm:$0xff] (!%p4622_p9)   ;;  %v5502_v47 = vld [vmem:[#allocation10 + $0x264] ss:$16 sps:$4 sm:$0xff] (!%p4622_p9)  }
 0x1bd   : > { %1911 = vmatprep.subr.bf16.mxu0 (!%p4622_p9), %v5428_v48  ;;  %1993 = vmatprep.subr.bf16.mxu1 (!%p4622_p9), %v5430_v49  ;;  %v5505_v48 = vld [vmem:[#allocation10 + $0x26c] ss:$16 sps:$4 sm:$0xff] (!%p4622_p9)   ;;  %v5500_v49 = vld [vmem:[#allocation10 + $0x260] ss:$16 sps:$4 sm:$0xff] (!%p4622_p9)  }
 0x1c0   : > { %1912 = vmatpush1.bf16.msra.mxu0 (!%p4622_p9), %v5432_v50  ;;  %1994 = vmatpush1.bf16.msra.mxu1 (!%p4622_p9), %v5433_v51  ;;  %v5503_v50 = vld [vmem:[#allocation10 + $0x268] ss:$16 sps:$4 sm:$0xff] (!%p4622_p9)   ;;  %v5508_v51 = vld [vmem:[#allocation10 + $0x284] ss:$16 sps:$4 sm:$0xff] (!%p4622_p9)  }
 0x1c1   : > { %1913 = vmatprep.subr.bf16.mxu0 (!%p4622_p9), %v5434_v52  ;;  %1995 = vmatprep.subr.bf16.mxu1 (!%p4622_p9), %v5436_v53  ;;  %v5511_v52 = vld [vmem:[#allocation10 + $0x28c] ss:$16 sps:$4 sm:$0xff] (!%p4622_p9)   ;;  %v5506_v53 = vld [vmem:[#allocation10 + $0x280] ss:$16 sps:$4 sm:$0xff] (!%p4622_p9)  }
 0x1c4   : > { %1914 = vmatpush1.bf16.msra.mxu0 (!%p4622_p9), %v5438_v54  ;;  %1996 = vmatpush1.bf16.msra.mxu1 (!%p4622_p9), %v5439_v55  ;;  %v6982_v54 = vsub.s32 (!%p4622_p9), 3, %v6967_v62  ;;  %v5509_v55 = vld [vmem:[#allocation10 + $0x288] ss:$16 sps:$4 sm:$0xff] (!%p4622_p9)  }
 0x1c5   : > { %1915 = vmatprep.subr.bf16.mxu0 (!%p4622_p9), %v5440_v56  ;;  %1997 = vmatprep.subr.bf16.mxu1 (!%p4622_p9), %v5442_v58  ;;  %v5514_v56 = vld [vmem:[#allocation10 + $0x2a4] ss:$16 sps:$4 sm:$0xff] (!%p4622_p9)   ;;  %v5512_v58 = vld [vmem:[#allocation10 + $0x2a0] ss:$16 sps:$4 sm:$0xff] (!%p4622_p9)  }
 0x1c8   : > { %1916 = vmatpush1.bf16.msra.mxu0 (!%p4622_p9), %v5444_v59  ;;  %1998 = vmatpush1.bf16.msra.mxu1 (!%p4622_p9), %v5445_v60  ;;  %v5515_v60 = vld [vmem:[#allocation10 + $0x2a8] ss:$16 sps:$4 sm:$0xff] (!%p4622_p9)  }
 0x1c9   : > { %1917 = vmatprep.subr.bf16.mxu0 (!%p4622_p9), %v5446_v61  ;;  %1999 = vmatprep.subr.bf16.mxu1 (!%p4622_p9), %v5448_v63  ;;  %v5520_v61 = vld [vmem:[#allocation10 + $0x2c4] ss:$16 sps:$4 sm:$0xff] (!%p4622_p9)   ;;  %v5523_v63 = vld [vmem:[#allocation10 + $0x2cc] ss:$16 sps:$4 sm:$0xff] (!%p4622_p9)  }
 0x1cc   : > { %1918 = vmatpush1.bf16.msra.mxu0 (!%p4622_p9), %v5450_v0  ;;  %2000 = vmatpush1.bf16.msra.mxu1 (!%p4622_p9), %v5451_v1  ;;  %v5518_v1 = vld [vmem:[#allocation10 + $0x2c0] ss:$16 sps:$4 sm:$0xff] (!%p4622_p9)  }
 0x1cd   : > { %1919 = vmatprep.subr.bf16.mxu0 (!%p4622_p9), %v5452_v2 }
 0x274   : > { %1068 = sbr.rel (%p4622_p9) target bundleno = 1916 (0x77c), region = 124 }
 0x276   : > { %v1009_v8 = vpop.f32.mrb[0].mxu0  ;;  %v1050_v9 = vpop.f32.mrb[0].mxu1 }
 0x277   : > { %v1057_v10 = vadd.f32 %v1009_v8, %v580_v4  ;;  %v1059_v11 = vadd.f32 %v1050_v9, %v582_v5  ;;  %v1011_v12 = vpop.f32.mrb[1].mxu0  ;;  %v1052_v13 = vpop.f32.mrb[1].mxu1  ;;  %v5454_v4 = vld [vmem:[#allocation10 + $0x16c] ss:$16 sps:$4 sm:$0xff] (!%p4622_p9)   ;;  %v5457_v8 = vld [vmem:[#allocation10 + $0x168] ss:$16 sps:$4 sm:$0xff] (!%p4622_p9)  }
 0x278   : > { %v1058_v14 = vadd.f32 %v1011_v12, %v581_v6  ;;  %v1060_v15 = vadd.f32 %v1052_v13, %v583_v7  ;;  %v1013_v16 = vpop.f32.mrb[2].mxu0  ;;  %v1054_v17 = vpop.f32.mrb[2].mxu1  ;;  %v6972_v6 = vld [vmem:[#allocation9] sm:$0xf] (!%p4622_p9)  ;;  %v5456_v7 = vld [vmem:[#allocation10 + $0x160] ss:$16 sps:$4 sm:$0xff] (!%p4622_p9)   ;;  %2001 = vmatprep.subr.bf16.mxu1 (!%p4622_p9), %v5454_v4 }
 0x279   : > { %1061 = vst [vmem:[#allocation2] sm:$0xff] %v1057_v10  ;;  %1063 = vst [vmem:[#allocation2 + $0x10] sm:$0xff] %v1059_v11  ;;  %v1014_v18 = vpop.f32.mrb[3].mxu0  ;;  %v1055_v19 = vpop.f32.mrb[3].mxu1  ;;  %v1082_v9 = vrot.slane (!%p4622_p9), %v6972_v6, %v6970_v3  ;;  %v5458_v10 = vld [vmem:[#allocation10 + $0x184] ss:$16 sps:$4 sm:$0xff] (!%p4622_p9)   ;;  %1920 = vmatpush1.bf16.msra.mxu0 (!%p4622_p9), %v5456_v7  ;;  %2002 = vmatpush1.bf16.msra.mxu1 (!%p4622_p9), %v5457_v8  ;;  %v1090_v59 = vrot.slane (!%p4622_p9), %v6972_v6, %v6982_v54 }
 0x27a   : > { %1062 = vst [vmem:[#allocation2 + $0x8] sm:$0xff] %v1058_v14  ;;  %1064 = vst [vmem:[#allocation2 + $0x18] sm:$0xff] %v1060_v15  ;;  %v5460_v11 = vld [vmem:[#allocation10 + $0x18c] ss:$16 sps:$4 sm:$0xff] (!%p4622_p9)   ;;  %v5462_v13 = vld [vmem:[#allocation10 + $0x180] ss:$16 sps:$4 sm:$0xff] (!%p4622_p9)   ;;  %1921 = vmatprep.subr.bf16.mxu0 (!%p4622_p9), %v5458_v10 }
 0x27b   : > { %v6977_v14 = vsub.s32 0, %v6967_v62  ;;  %v5463_v15 = vld [vmem:[#allocation10 + $0x188] ss:$16 sps:$4 sm:$0xff]   ;;  %v5464_v16 = vld [vmem:[#allocation10 + $0x1a4] ss:$16 sps:$4 sm:$0xff]   ;;  %2003 = vmatprep.subr.bf16.mxu1 %v5460_v11 }
 0x27c   : > { %v5466_v18 = vld [vmem:[#allocation10 + $0x1ac] ss:$16 sps:$4 sm:$0xff]   ;;  %v5521_v4 = vld [vmem:[#allocation10 + $0x2c8] ss:$16 sps:$4 sm:$0xff]   ;;  %v5524_v10 = vld [vmem:[#allocation10 + $0x2e0] ss:$16 sps:$4 sm:$0xff]  }
 0x27d   : > { %v1078_v22 = vrot.slane %v6972_v6, %v6977_v14  ;;  %1922 = vmatpush1.bf16.msra.mxu0 %v5462_v13  ;;  %2004 = vmatpush1.bf16.msra.mxu1 %v5463_v15  ;;  %v5529_v7 = vld [vmem:[#allocation10 + $0x2ec] ss:$16 sps:$4 sm:$0xff]   ;;  %v5527_v11 = vld [vmem:[#allocation10 + $0x2e8] ss:$16 sps:$4 sm:$0xff]   ;;  %v5530_v15 = vld [vmem:[#allocation10 + $0x300] ss:$16 sps:$4 sm:$0xff]  }
 0x27e   : > { %1923 = vmatprep.subr.bf16.mxu0 %v5464_v16  ;;  %2005 = vmatprep.subr.bf16.mxu1 %v5466_v18  ;;  %v5535_v13 = vld [vmem:[#allocation10 + $0x30c] ss:$16 sps:$4 sm:$0xff]   ;;  %v5533_v16 = vld [vmem:[#allocation10 + $0x308] ss:$16 sps:$4 sm:$0xff]  }
 0x27f   : > { %v5541_v18 = vld [vmem:[#allocation10 + $0x32c] ss:$16 sps:$4 sm:$0xff]  }
 0x280   : > { %v1069_v24 = vld [vmem:[#allocation2] sm:$0xff] }
 0x281   : > { %v1070_v5 = vld [vmem:[#allocation2 + $0x8] sm:$0xff]  ;;  %v1095_v27 = vadd.f32 %v1078_v22, %v1069_v24  ;;  %1924 = vmatpush1.bf16.msra.mxu0 %v5468_v20  ;;  %2006 = vmatpush1.bf16.msra.mxu1 %v5469_v21  ;;  %v1072_v0 = vld [vmem:[#allocation2 + $0x18] sm:$0xff]  ;;  %v5547_v22 = vld [vmem:[#allocation10 + $0x34c] ss:$16 sps:$4 sm:$0xff]  }
 0x282   : > { %v1096_v12 = vadd.f32 %v1082_v9, %v1070_v5  ;;  %1925 = vmatprep.subr.bf16.mxu0 %v5470_v23  ;;  %2007 = vmatprep.subr.bf16.mxu1 %v5472_v25  ;;  %v1098_v2 = vadd.f32 %v1090_v59, %v1072_v0  ;;  %v5526_v5 = vld [vmem:[#allocation10 + $0x2e4] ss:$16 sps:$4 sm:$0xff]   ;;  %v5539_v20 = vld [vmem:[#allocation10 + $0x328] ss:$16 sps:$4 sm:$0xff]   ;;  %v5542_v23 = vld [vmem:[#allocation10 + $0x340] ss:$16 sps:$4 sm:$0xff]  }
 0x283   : > { %v1099_v32 = vmax.f32 %v1095_v27, 0.0  ;;  %v5544_v21 = vld [vmem:[#allocation10 + $0x344] ss:$16 sps:$4 sm:$0xff]   ;;  %v5545_v24 = vld [vmem:[#allocation10 + $0x348] ss:$16 sps:$4 sm:$0xff]  }
 0x284   : > { %v1100_v17 = vmax.f32 %v1096_v12, 0.0  ;;  %v1102_v8 = vmax.f32 %v1098_v2, 0.0  ;;  %v5532_v12 = vld [vmem:[#allocation10 + $0x304] ss:$16 sps:$4 sm:$0xff]   ;;  %v5548_v27 = vld [vmem:[#allocation10 + $0x360] ss:$16 sps:$4 sm:$0xff]  }
 0x285   : > { %1926 = vmatpush1.bf16.msra.mxu0 %v5474_v26  ;;  %2008 = vmatpush1.bf16.msra.mxu1 %v5475_v28  ;;  %v1103_v37 = vpack.c.bf16 %v1099_v32, %v1099_v32  ;;  %v5550_v25 = vld [vmem:[#allocation10 + $0x364] ss:$16 sps:$4 sm:$0xff]   ;;  %v5553_v26 = vld [vmem:[#allocation10 + $0x36c] ss:$16 sps:$4 sm:$0xff]   ;;  %v5551_v28 = vld [vmem:[#allocation10 + $0x368] ss:$16 sps:$4 sm:$0xff]  }
 0x286   : > { %v1104_v19 = vpack.c.bf16 %v1100_v17, %v1100_v17  ;;  %1927 = vmatprep.subr.bf16.mxu0 %v5476_v29  ;;  %2009 = vmatprep.subr.bf16.mxu1 %v5478_v30  ;;  %v1106_v9 = vpack.c.bf16 %v1102_v8, %v1102_v8  ;;  %v5538_v17 = vld [vmem:[#allocation10 + $0x324] ss:$16 sps:$4 sm:$0xff]   ;;  %v5559_v30 = vld [vmem:[#allocation10 + $0x38c] ss:$16 sps:$4 sm:$0xff]   ;;  %v5554_v32 = vld [vmem:[#allocation10 + $0x380] ss:$16 sps:$4 sm:$0xff]  }
 0x287   : > { %v5556_v29 = vld [vmem:[#allocation10 + $0x384] ss:$16 sps:$4 sm:$0xff]   ;;  %v5595_v59 = vld [vmem:[#allocation13 + $0x4c] ss:$16 sps:$4 sm:$0xff]   ;;  %v5599_v2 = vld [vmem:[#allocation13 + $0x68] ss:$16 sps:$4 sm:$0xff]  }
 0x288   : > { %1929 = vmatprep.mubr.bf16.mxu0 %v1104_v19  ;;  %2011 = vmatprep.mubr.bf16.mxu1 %v1104_v19  ;;  %v5536_v19 = vld [vmem:[#allocation10 + $0x320] ss:$16 sps:$4 sm:$0xff]   ;;  %v5605_v8 = vld [vmem:[#allocation13 + $0x88] ss:$16 sps:$4 sm:$0xff]  }
 0x289   : > { %1928 = vmatpush1.bf16.msra.mxu0 %v5480_v31  ;;  %2010 = vmatpush1.bf16.msra.mxu1 %v5481_v33  ;;  %v6987_v31 = vsub.s32 2, %v6967_v62  ;;  %v5557_v33 = vld [vmem:[#allocation10 + $0x388] ss:$16 sps:$4 sm:$0xff]   ;;  %v5568_v62 = vld [vmem:[#allocation10 + $0x3c4] ss:$16 sps:$4 sm:$0xff]  }
 0x28a   : > { %1938 = vmatprep.subr.bf16.mxu0 %v5484_v34  ;;  %2020 = vmatprep.subr.bf16.mxu1 %v5487_v35  ;;  %v5562_v34 = vld [vmem:[#allocation10 + $0x3a4] ss:$16 sps:$4 sm:$0xff]   ;;  %v5565_v35 = vld [vmem:[#allocation10 + $0x3ac] ss:$16 sps:$4 sm:$0xff]   ;;  %v5601_v0 = vld [vmem:[#allocation13 + $0x6c] ss:$16 sps:$4 sm:$0xff]  }
 0x28c   : > { %1930 = vmatmul.mubr.bf16.vlgmr.msra.gmra.mrb[0].mxu0 %v1103_v37  ;;  %2012 = vmatmul.mubr.bf16.vlgmr.msra.gmra.mrb[0].mxu1 %v1103_v37  ;;  %v1086_v37 = vrot.slane %v6972_v6, %v6987_v31  ;;  %v5575_v6 = vld [vmem:[#allocation10 + $0x3e8] ss:$16 sps:$4 sm:$0xff]  }
 0x28d   : > { %1939 = vmatpush1.bf16.msra.mxu0 %v5482_v36  ;;  %2021 = vmatpush1.bf16.msra.mxu1 %v5485_v38  ;;  %v5560_v36 = vld [vmem:[#allocation10 + $0x3a0] ss:$16 sps:$4 sm:$0xff]   ;;  %v5563_v38 = vld [vmem:[#allocation10 + $0x3a8] ss:$16 sps:$4 sm:$0xff]  }
 0x28e   : > { %1940 = vmatprep.subr.bf16.mxu0 %v5490_v39  ;;  %2022 = vmatprep.subr.bf16.mxu1 %v5493_v40  ;;  %v1071_v39 = vld [vmem:[#allocation2 + $0x10] sm:$0xff] }
 0x28f   : > { %1970 = vmatprep.mubr.bf16.mxu0 %v1106_v9  ;;  %2052 = vmatprep.mubr.bf16.mxu1 %v1106_v9  ;;  %v5571_v40 = vld [vmem:[#allocation10 + $0x3cc] ss:$16 sps:$4 sm:$0xff]   ;;  %v5610_v9 = vld [vmem:[#allocation13 + $0xa4] ss:$16 sps:$4 sm:$0xff]  }
 0x291   : > { %1941 = vmatpush1.bf16.msra.mxu0 %v5488_v41  ;;  %2023 = vmatpush1.bf16.msra.mxu1 %v5491_v42  ;;  %v1097_v41 = vadd.f32 %v1086_v37, %v1071_v39  ;;  %v5566_v42 = vld [vmem:[#allocation10 + $0x3c0] ss:$16 sps:$4 sm:$0xff]   ;;  %v5644_v37 = vld [vmem:[#allocation13 + $0x160] ss:$16 sps:$4 sm:$0xff]   ;;  %v5652_v39 = vld [vmem:[#allocation13 + $0x184] ss:$16 sps:$4 sm:$0xff]  }
 0x292   : > { %1942 = vmatprep.subr.bf16.mxu0 %v5496_v43  ;;  %2024 = vmatprep.subr.bf16.mxu1 %v5499_v44  ;;  %v5569_v43 = vld [vmem:[#allocation10 + $0x3c8] ss:$16 sps:$4 sm:$0xff]   ;;  %v5574_v44 = vld [vmem:[#allocation10 + $0x3e4] ss:$16 sps:$4 sm:$0xff]  }
 0x295   : > { %1943 = vmatpush1.bf16.msra.mxu0 %v5494_v45  ;;  %2025 = vmatpush1.bf16.msra.mxu1 %v5497_v46  ;;  %v5577_v45 = vld [vmem:[#allocation10 + $0x3ec] ss:$16 sps:$4 sm:$0xff]   ;;  %v5572_v46 = vld [vmem:[#allocation10 + $0x3e0] ss:$16 sps:$4 sm:$0xff]  }
 0x296   : > { %1944 = vmatprep.subr.bf16.mxu0 %v5502_v47  ;;  %2026 = vmatprep.subr.bf16.mxu1 %v5505_v48  ;;  %v1101_v47 = vmax.f32 %v1097_v41, 0.0  ;;  %v5580_v48 = vld [vmem:[#allocation13 + $0x4] ss:$16 sps:$4 sm:$0xff]   ;;  %v5653_v41 = vld [vmem:[#allocation13 + $0x188] ss:$16 sps:$4 sm:$0xff]  }
 0x299   : > { %1945 = vmatpush1.bf16.msra.mxu0 %v5500_v49  ;;  %2027 = vmatpush1.bf16.msra.mxu1 %v5503_v50  ;;  %v5583_v49 = vld [vmem:[#allocation13 + $0xc] ss:$16 sps:$4 sm:$0xff]   ;;  %v5578_v50 = vld [vmem:[#allocation13] ss:$16 sps:$4 sm:$0xff]  }
 0x29a   : > { %1946 = vmatprep.subr.bf16.mxu0 %v5508_v51  ;;  %2028 = vmatprep.subr.bf16.mxu1 %v5511_v52  ;;  %v5581_v51 = vld [vmem:[#allocation13 + $0x8] ss:$16 sps:$4 sm:$0xff]   ;;  %v1105_v52 = vpack.c.bf16 %v1101_v47, %v1101_v47  ;;  %v5667_v47 = vld [vmem:[#allocation13 + $0x1cc] ss:$16 sps:$4 sm:$0xff]  }
 0x29d   : > { %1947 = vmatpush1.bf16.msra.mxu0 %v5506_v53  ;;  %2029 = vmatpush1.bf16.msra.mxu1 %v5509_v55  ;;  %v5586_v53 = vld [vmem:[#allocation13 + $0x24] ss:$16 sps:$4 sm:$0xff]   ;;  %v5589_v55 = vld [vmem:[#allocation13 + $0x2c] ss:$16 sps:$4 sm:$0xff]  }
 0x29e   : > { %1948 = vmatprep.subr.bf16.mxu0 %v5514_v56  ;;  %2030 = vmatprep.subr.bf16.mxu1 %v5517_v57  ;;  %v5584_v56 = vld [vmem:[#allocation13 + $0x20] ss:$16 sps:$4 sm:$0xff]   ;;  %v5587_v57 = vld [vmem:[#allocation13 + $0x28] ss:$16 sps:$4 sm:$0xff]  }
 0x2a1   : > { %1949 = vmatpush1.bf16.msra.mxu0 %v5512_v58  ;;  %2031 = vmatpush1.bf16.msra.mxu1 %v5515_v60  ;;  %v5592_v58 = vld [vmem:[#allocation13 + $0x44] ss:$16 sps:$4 sm:$0xff]   ;;  %v5590_v60 = vld [vmem:[#allocation13 + $0x40] ss:$16 sps:$4 sm:$0xff]  }
 0x2a2   : > { %1950 = vmatprep.subr.bf16.mxu0 %v5520_v61  ;;  %2032 = vmatprep.subr.bf16.mxu1 %v5523_v63  ;;  %v5593_v61 = vld [vmem:[#allocation13 + $0x48] ss:$16 sps:$4 sm:$0xff]   ;;  %v5598_v63 = vld [vmem:[#allocation13 + $0x64] ss:$16 sps:$4 sm:$0xff]  }
 0x2a5   : > { %1951 = vmatpush1.bf16.msra.mxu0 %v5518_v1  ;;  %2033 = vmatpush1.bf16.msra.mxu1 %v5521_v4  ;;  %v5596_v1 = vld [vmem:[#allocation13 + $0x60] ss:$16 sps:$4 sm:$0xff]   ;;  %v5604_v4 = vld [vmem:[#allocation13 + $0x84] ss:$16 sps:$4 sm:$0xff]  }
 0x2a6   : > { %1952 = vmatprep.subr.bf16.mxu0 %v5526_v5  ;;  %2034 = vmatprep.subr.bf16.mxu1 %v5529_v7  ;;  %v5607_v5 = vld [vmem:[#allocation13 + $0x8c] ss:$16 sps:$4 sm:$0xff]   ;;  %v5602_v7 = vld [vmem:[#allocation13 + $0x80] ss:$16 sps:$4 sm:$0xff]  }
 0x2a9   : > { %1953 = vmatpush1.bf16.msra.mxu0 %v5524_v10  ;;  %2035 = vmatpush1.bf16.msra.mxu1 %v5527_v11  ;;  %v5613_v10 = vld [vmem:[#allocation13 + $0xac] ss:$16 sps:$4 sm:$0xff]   ;;  %v5608_v11 = vld [vmem:[#allocation13 + $0xa0] ss:$16 sps:$4 sm:$0xff]  }
 0x2aa   : > { %1954 = vmatprep.subr.bf16.mxu0 %v5532_v12  ;;  %2036 = vmatprep.subr.bf16.mxu1 %v5535_v13  ;;  %v5611_v12 = vld [vmem:[#allocation13 + $0xa8] ss:$16 sps:$4 sm:$0xff]   ;;  %v5616_v13 = vld [vmem:[#allocation13 + $0xc4] ss:$16 sps:$4 sm:$0xff]  }
 0x2ad   : > { %1955 = vmatpush1.bf16.msra.mxu0 %v5530_v15  ;;  %2037 = vmatpush1.bf16.msra.mxu1 %v5533_v16  ;;  %v5619_v15 = vld [vmem:[#allocation13 + $0xcc] ss:$16 sps:$4 sm:$0xff]   ;;  %v5614_v16 = vld [vmem:[#allocation13 + $0xc0] ss:$16 sps:$4 sm:$0xff]  }
 0x2ae   : > { %1956 = vmatprep.subr.bf16.mxu0 %v5538_v17  ;;  %2038 = vmatprep.subr.bf16.mxu1 %v5541_v18  ;;  %v5617_v17 = vld [vmem:[#allocation13 + $0xc8] ss:$16 sps:$4 sm:$0xff]   ;;  %v5622_v18 = vld [vmem:[#allocation13 + $0xe4] ss:$16 sps:$4 sm:$0xff]  }
 0x2b1   : > { %1957 = vmatpush1.bf16.msra.mxu0 %v5536_v19  ;;  %2039 = vmatpush1.bf16.msra.mxu1 %v5539_v20  ;;  %v5625_v19 = vld [vmem:[#allocation13 + $0xec] ss:$16 sps:$4 sm:$0xff]   ;;  %v5620_v20 = vld [vmem:[#allocation13 + $0xe0] ss:$16 sps:$4 sm:$0xff]  }
 0x2b2   : > { %1958 = vmatprep.subr.bf16.mxu0 %v5544_v21  ;;  %2040 = vmatprep.subr.bf16.mxu1 %v5547_v22  ;;  %v5623_v21 = vld [vmem:[#allocation13 + $0xe8] ss:$16 sps:$4 sm:$0xff]   ;;  %v5628_v22 = vld [vmem:[#allocation13 + $0x104] ss:$16 sps:$4 sm:$0xff]  }
 0x2b5   : > { %1959 = vmatpush1.bf16.msra.mxu0 %v5542_v23  ;;  %2041 = vmatpush1.bf16.msra.mxu1 %v5545_v24  ;;  %v5631_v23 = vld [vmem:[#allocation13 + $0x10c] ss:$16 sps:$4 sm:$0xff]   ;;  %v5626_v24 = vld [vmem:[#allocation13 + $0x100] ss:$16 sps:$4 sm:$0xff]  }
 0x2b6   : > { %1960 = vmatprep.subr.bf16.mxu0 %v5550_v25  ;;  %2042 = vmatprep.subr.bf16.mxu1 %v5553_v26  ;;  %v5629_v25 = vld [vmem:[#allocation13 + $0x108] ss:$16 sps:$4 sm:$0xff]   ;;  %v5634_v26 = vld [vmem:[#allocation13 + $0x124] ss:$16 sps:$4 sm:$0xff]  }
 0x2b9   : > { %1961 = vmatpush1.bf16.msra.mxu0 %v5548_v27  ;;  %2043 = vmatpush1.bf16.msra.mxu1 %v5551_v28  ;;  %v5637_v27 = vld [vmem:[#allocation13 + $0x12c] ss:$16 sps:$4 sm:$0xff]   ;;  %v5632_v28 = vld [vmem:[#allocation13 + $0x120] ss:$16 sps:$4 sm:$0xff]  }
 0x2ba   : > { %1962 = vmatprep.subr.bf16.mxu0 %v5556_v29  ;;  %2044 = vmatprep.subr.bf16.mxu1 %v5559_v30  ;;  %v5635_v29 = vld [vmem:[#allocation13 + $0x128] ss:$16 sps:$4 sm:$0xff]   ;;  %v5640_v30 = vld [vmem:[#allocation13 + $0x144] ss:$16 sps:$4 sm:$0xff]  }
 0x2bd   : > { %1963 = vmatpush1.bf16.msra.mxu0 %v5554_v32  ;;  %2045 = vmatpush1.bf16.msra.mxu1 %v5557_v33  ;;  %v5643_v32 = vld [vmem:[#allocation13 + $0x14c] ss:$16 sps:$4 sm:$0xff]   ;;  %v5638_v33 = vld [vmem:[#allocation13 + $0x140] ss:$16 sps:$4 sm:$0xff]  }
 0x2be   : > { %1964 = vmatprep.subr.bf16.mxu0 %v5562_v34  ;;  %2046 = vmatprep.subr.bf16.mxu1 %v5565_v35  ;;  %v5641_v34 = vld [vmem:[#allocation13 + $0x148] ss:$16 sps:$4 sm:$0xff]   ;;  %v5646_v35 = vld [vmem:[#allocation13 + $0x164] ss:$16 sps:$4 sm:$0xff]  }
 0x2c1   : > { %1965 = vmatpush1.bf16.msra.mxu0 %v5560_v36  ;;  %2047 = vmatpush1.bf16.msra.mxu1 %v5563_v38  ;;  %v5649_v36 = vld [vmem:[#allocation13 + $0x16c] ss:$16 sps:$4 sm:$0xff]   ;;  %v5647_v38 = vld [vmem:[#allocation13 + $0x168] ss:$16 sps:$4 sm:$0xff]  }
 0x2c2   : > { %1966 = vmatprep.subr.bf16.mxu0 %v5568_v62  ;;  %2048 = vmatprep.subr.bf16.mxu1 %v5571_v40  ;;  %v5655_v62 = vld [vmem:[#allocation13 + $0x18c] ss:$16 sps:$4 sm:$0xff]   ;;  %v5650_v40 = vld [vmem:[#allocation13 + $0x180] ss:$16 sps:$4 sm:$0xff]  }
 0x2c5   : > { %1967 = vmatpush1.bf16.msra.mxu0 %v5566_v42  ;;  %2049 = vmatpush1.bf16.msra.mxu1 %v5569_v43  ;;  %v5658_v42 = vld [vmem:[#allocation13 + $0x1a4] ss:$16 sps:$4 sm:$0xff]   ;;  %v5661_v43 = vld [vmem:[#allocation13 + $0x1ac] ss:$16 sps:$4 sm:$0xff]  }
 0x2c6   : > { %1968 = vmatprep.subr.bf16.mxu0 %v5574_v44  ;;  %2050 = vmatprep.subr.bf16.mxu1 %v5577_v45  ;;  %v5656_v44 = vld [vmem:[#allocation13 + $0x1a0] ss:$16 sps:$4 sm:$0xff]   ;;  %v5659_v45 = vld [vmem:[#allocation13 + $0x1a8] ss:$16 sps:$4 sm:$0xff]  }
 0x2c9   : > { %1969 = vmatpush1.bf16.msra.mxu0 %v5572_v46  ;;  %2051 = vmatpush1.bf16.msra.mxu1 %v5575_v6  ;;  %v5664_v46 = vld [vmem:[#allocation13 + $0x1c4] ss:$16 sps:$4 sm:$0xff]   ;;  %v5662_v6 = vld [vmem:[#allocation13 + $0x1c0] ss:$16 sps:$4 sm:$0xff]  }
 0x2ca   : > { %2859 = vmatprep.subr.bf16.mxu0 %v5580_v48  ;;  %2941 = vmatprep.subr.bf16.mxu1 %v5583_v49  ;;  %v5665_v48 = vld [vmem:[#allocation13 + $0x1c8] ss:$16 sps:$4 sm:$0xff]   ;;  %v5670_v49 = vld [vmem:[#allocation13 + $0x1e4] ss:$16 sps:$4 sm:$0xff]  }
 0x2cc   : > { %1971 = vmatmul.mubr.bf16.vlgmr.msra.gmra.mrb[0].mxu0 %v1105_v52  ;;  %2053 = vmatmul.mubr.bf16.vlgmr.msra.gmra.mrb[0].mxu1 %v1105_v52  ;;  %v5671_v52 = vld [vmem:[#allocation13 + $0x1e8] ss:$16 sps:$4 sm:$0xff]  }
 0x2cd   : > { %2860 = vmatpush1.bf16.msra.mxu0 %v5578_v50  ;;  %2942 = vmatpush1.bf16.msra.mxu1 %v5581_v51  ;;  %v5673_v50 = vld [vmem:[#allocation13 + $0x1ec] ss:$16 sps:$4 sm:$0xff]   ;;  %v5668_v51 = vld [vmem:[#allocation13 + $0x1e0] ss:$16 sps:$4 sm:$0xff]  }
 0x2ce   : > { %2861 = vmatprep.subr.bf16.mxu0 %v5586_v53  ;;  %2943 = vmatprep.subr.bf16.mxu1 %v5589_v55  ;;  %v5676_v53 = vld [vmem:[#allocation13 + $0x204] ss:$16 sps:$4 sm:$0xff]   ;;  %v5679_v55 = vld [vmem:[#allocation13 + $0x20c] ss:$16 sps:$4 sm:$0xff]  }
 0x2d1   : > { %2862 = vmatpush1.bf16.msra.mxu0 %v5584_v56  ;;  %2944 = vmatpush1.bf16.msra.mxu1 %v5587_v57  ;;  %v6991_v56 = vld [vmem:[#allocation12] sm:$0xf] }
 0x2d2   : > { %2863 = vmatprep.subr.bf16.mxu0 %v5592_v58  ;;  %2945 = vmatprep.subr.bf16.mxu1 %v5595_v59  ;;  %v1240_v57 = vrot.slane %v6991_v56, %v6977_v14  ;;  %v1244_v58 = vrot.slane %v6991_v56, %v6970_v3  ;;  %v1252_v59 = vrot.slane %v6991_v56, %v6982_v54 }
 0x2d5   : > { %2864 = vmatpush1.bf16.msra.mxu0 %v5590_v60  ;;  %2946 = vmatpush1.bf16.msra.mxu1 %v5593_v61 }
 0x2d6   : > { %2865 = vmatprep.subr.bf16.mxu0 %v5598_v63  ;;  %2947 = vmatprep.subr.bf16.mxu1 %v5601_v0 }
 0x2d9   : > { %2866 = vmatpush1.bf16.msra.mxu0 %v5596_v1  ;;  %2948 = vmatpush1.bf16.msra.mxu1 %v5599_v2 }
 0x2da   : > { %2867 = vmatprep.subr.bf16.mxu0 %v5604_v4  ;;  %2949 = vmatprep.subr.bf16.mxu1 %v5607_v5 }
 0x2dd   : > { %2868 = vmatpush1.bf16.msra.mxu0 %v5602_v7  ;;  %2950 = vmatpush1.bf16.msra.mxu1 %v5605_v8 }
 0x2de   : > { %2869 = vmatprep.subr.bf16.mxu0 %v5610_v9  ;;  %2951 = vmatprep.subr.bf16.mxu1 %v5613_v10 }
 0x2e1   : > { %2870 = vmatpush1.bf16.msra.mxu0 %v5608_v11  ;;  %2952 = vmatpush1.bf16.msra.mxu1 %v5611_v12 }
 0x2e2   : > { %2871 = vmatprep.subr.bf16.mxu0 %v5616_v13  ;;  %2953 = vmatprep.subr.bf16.mxu1 %v5619_v15  ;;  %v5674_v15 = vld [vmem:[#allocation13 + $0x200] ss:$16 sps:$4 sm:$0xff]  }
 0x2e5   : > { %2872 = vmatpush1.bf16.msra.mxu0 %v5614_v16  ;;  %2954 = vmatpush1.bf16.msra.mxu1 %v5617_v17  ;;  %v5677_v16 = vld [vmem:[#allocation13 + $0x208] ss:$16 sps:$4 sm:$0xff]  }
 0x2e6   : > { %2873 = vmatprep.subr.bf16.mxu0 %v5622_v18  ;;  %2955 = vmatprep.subr.bf16.mxu1 %v5625_v19  ;;  %v5682_v18 = vld [vmem:[#allocation13 + $0x224] ss:$16 sps:$4 sm:$0xff]   ;;  %v5685_v19 = vld [vmem:[#allocation13 + $0x22c] ss:$16 sps:$4 sm:$0xff]  }
 0x2e9   : > { %2874 = vmatpush1.bf16.msra.mxu0 %v5620_v20  ;;  %2956 = vmatpush1.bf16.msra.mxu1 %v5623_v21  ;;  %v5680_v21 = vld [vmem:[#allocation13 + $0x220] ss:$16 sps:$4 sm:$0xff]  }
 0x2ea   : > { %2875 = vmatprep.subr.bf16.mxu0 %v5628_v22  ;;  %2957 = vmatprep.subr.bf16.mxu1 %v5631_v23  ;;  %v5683_v22 = vld [vmem:[#allocation13 + $0x228] ss:$16 sps:$4 sm:$0xff]   ;;  %v5688_v23 = vld [vmem:[#allocation13 + $0x244] ss:$16 sps:$4 sm:$0xff]  }
 0x2ed   : > { %2876 = vmatpush1.bf16.msra.mxu0 %v5626_v24  ;;  %2958 = vmatpush1.bf16.msra.mxu1 %v5629_v25  ;;  %v5691_v24 = vld [vmem:[#allocation13 + $0x24c] ss:$16 sps:$4 sm:$0xff]   ;;  %v5686_v25 = vld [vmem:[#allocation13 + $0x240] ss:$16 sps:$4 sm:$0xff]  }
 0x2ee   : > { %2877 = vmatprep.subr.bf16.mxu0 %v5634_v26  ;;  %2959 = vmatprep.subr.bf16.mxu1 %v5637_v27  ;;  %v5689_v26 = vld [vmem:[#allocation13 + $0x248] ss:$16 sps:$4 sm:$0xff]   ;;  %v5694_v27 = vld [vmem:[#allocation13 + $0x264] ss:$16 sps:$4 sm:$0xff]  }
 0x2f1   : > { %2878 = vmatpush1.bf16.msra.mxu0 %v5632_v28  ;;  %2960 = vmatpush1.bf16.msra.mxu1 %v5635_v29  ;;  %v5697_v28 = vld [vmem:[#allocation13 + $0x26c] ss:$16 sps:$4 sm:$0xff]   ;;  %v5692_v29 = vld [vmem:[#allocation13 + $0x260] ss:$16 sps:$4 sm:$0xff]  }
 0x2f2   : > { %2879 = vmatprep.subr.bf16.mxu0 %v5640_v30  ;;  %2961 = vmatprep.subr.bf16.mxu1 %v5643_v32  ;;  %v5695_v30 = vld [vmem:[#allocation13 + $0x268] ss:$16 sps:$4 sm:$0xff]   ;;  %v5700_v32 = vld [vmem:[#allocation13 + $0x284] ss:$16 sps:$4 sm:$0xff]  }
 0x2f5   : > { %2880 = vmatpush1.bf16.msra.mxu0 %v5638_v33  ;;  %2962 = vmatpush1.bf16.msra.mxu1 %v5641_v34  ;;  %v5703_v33 = vld [vmem:[#allocation13 + $0x28c] ss:$16 sps:$4 sm:$0xff]   ;;  %v5698_v34 = vld [vmem:[#allocation13 + $0x280] ss:$16 sps:$4 sm:$0xff]  }
 0x2f6   : > { %2881 = vmatprep.subr.bf16.mxu0 %v5646_v35  ;;  %2963 = vmatprep.subr.bf16.mxu1 %v5649_v36  ;;  %v5701_v35 = vld [vmem:[#allocation13 + $0x288] ss:$16 sps:$4 sm:$0xff]   ;;  %v5706_v36 = vld [vmem:[#allocation13 + $0x2a4] ss:$16 sps:$4 sm:$0xff]  }
 0x2f9   : > { %2882 = vmatpush1.bf16.msra.mxu0 %v5644_v37  ;;  %2964 = vmatpush1.bf16.msra.mxu1 %v5647_v38  ;;  %v5709_v37 = vld [vmem:[#allocation13 + $0x2ac] ss:$16 sps:$4 sm:$0xff]   ;;  %v5704_v38 = vld [vmem:[#allocation13 + $0x2a0] ss:$16 sps:$4 sm:$0xff]  }
 0x2fa   : > { %2883 = vmatprep.subr.bf16.mxu0 %v5652_v39  ;;  %2965 = vmatprep.subr.bf16.mxu1 %v5655_v62  ;;  %v5707_v39 = vld [vmem:[#allocation13 + $0x2a8] ss:$16 sps:$4 sm:$0xff]   ;;  %v5712_v62 = vld [vmem:[#allocation13 + $0x2c4] ss:$16 sps:$4 sm:$0xff]  }
 0x2fd   : > { %2884 = vmatpush1.bf16.msra.mxu0 %v5650_v40  ;;  %2966 = vmatpush1.bf16.msra.mxu1 %v5653_v41  ;;  %v5715_v40 = vld [vmem:[#allocation13 + $0x2cc] ss:$16 sps:$4 sm:$0xff]   ;;  %v5710_v41 = vld [vmem:[#allocation13 + $0x2c0] ss:$16 sps:$4 sm:$0xff]  }
 0x2fe   : > { %2885 = vmatprep.subr.bf16.mxu0 %v5658_v42  ;;  %2967 = vmatprep.subr.bf16.mxu1 %v5661_v43  ;;  %v5713_v42 = vld [vmem:[#allocation13 + $0x2c8] ss:$16 sps:$4 sm:$0xff]   ;;  %v5718_v43 = vld [vmem:[#allocation13 + $0x2e4] ss:$16 sps:$4 sm:$0xff]  }
 0x301   : > { %2886 = vmatpush1.bf16.msra.mxu0 %v5656_v44  ;;  %2968 = vmatpush1.bf16.msra.mxu1 %v5659_v45  ;;  %v5721_v44 = vld [vmem:[#allocation13 + $0x2ec] ss:$16 sps:$4 sm:$0xff]   ;;  %v5716_v45 = vld [vmem:[#allocation13 + $0x2e0] ss:$16 sps:$4 sm:$0xff]  }
 0x302   : > { %2887 = vmatprep.subr.bf16.mxu0 %v5664_v46  ;;  %2969 = vmatprep.subr.bf16.mxu1 %v5667_v47  ;;  %v5719_v46 = vld [vmem:[#allocation13 + $0x2e8] ss:$16 sps:$4 sm:$0xff]   ;;  %v5724_v47 = vld [vmem:[#allocation13 + $0x304] ss:$16 sps:$4 sm:$0xff]  }
 0x305   : > { %2888 = vmatpush1.bf16.msra.mxu0 %v5662_v6  ;;  %2970 = vmatpush1.bf16.msra.mxu1 %v5665_v48  ;;  %v5727_v6 = vld [vmem:[#allocation13 + $0x30c] ss:$16 sps:$4 sm:$0xff]   ;;  %v5722_v48 = vld [vmem:[#allocation13 + $0x300] ss:$16 sps:$4 sm:$0xff]  }
 0x306   : > { %2889 = vmatprep.subr.bf16.mxu0 %v5670_v49  ;;  %2971 = vmatprep.subr.bf16.mxu1 %v5673_v50  ;;  %v5725_v49 = vld [vmem:[#allocation13 + $0x308] ss:$16 sps:$4 sm:$0xff]   ;;  %v5730_v50 = vld [vmem:[#allocation13 + $0x324] ss:$16 sps:$4 sm:$0xff]  }
 0x309   : > { %2890 = vmatpush1.bf16.msra.mxu0 %v5668_v51  ;;  %2972 = vmatpush1.bf16.msra.mxu1 %v5671_v52  ;;  %v5733_v51 = vld [vmem:[#allocation13 + $0x32c] ss:$16 sps:$4 sm:$0xff]   ;;  %v5728_v52 = vld [vmem:[#allocation13 + $0x320] ss:$16 sps:$4 sm:$0xff]  }
 0x30a   : > { %2900 = vmatprep.subr.bf16.mxu0 %v5676_v53  ;;  %2982 = vmatprep.subr.bf16.mxu1 %v5679_v55  ;;  %v5731_v53 = vld [vmem:[#allocation13 + $0x328] ss:$16 sps:$4 sm:$0xff]   ;;  %v5736_v55 = vld [vmem:[#allocation13 + $0x344] ss:$16 sps:$4 sm:$0xff]  }
 0x39f   : > { %v1972_v60 = vpop.f32.mrb[0].mxu0  ;;  %v6999_v61 = vpop.f32.mrb[0].mxu1 }
 0x3a0   : > { %v5090_v63 = vadd.f32 %v1972_v60, %v1240_v57  ;;  %v1974_v0 = vpop.f32.mrb[1].mxu0  ;;  %v2056_v1 = vpop.f32.mrb[1].mxu1  ;;  %v5739_v57 = vld [vmem:[#allocation13 + $0x34c] ss:$16 sps:$4 sm:$0xff]   ;;  %v5742_v60 = vld [vmem:[#allocation13 + $0x364] ss:$16 sps:$4 sm:$0xff]  }
 0x3a1   : > { %v5091_v2 = vadd.f32 %v1974_v0, %v1244_v58  ;;  %v5093_v4 = vadd.f32 %v2056_v1, %v1252_v59  ;;  %v1976_v5 = vpop.f32.mrb[2].mxu0  ;;  %v2058_v7 = vpop.f32.mrb[2].mxu1  ;;  %v5734_v58 = vld [vmem:[#allocation13 + $0x340] ss:$16 sps:$4 sm:$0xff]   ;;  %v5737_v59 = vld [vmem:[#allocation13 + $0x348] ss:$16 sps:$4 sm:$0xff]  }
 0x3a2   : > { %v2061_v8 = vmax.f32 %v5090_v63, 0.0  ;;  %v1977_v9 = vpop.f32.mrb[3].mxu0  ;;  %v2059_v10 = vpop.f32.mrb[3].mxu1  ;;  %v5745_v63 = vld [vmem:[#allocation13 + $0x36c] ss:$16 sps:$4 sm:$0xff]  }
 0x3a3   : > { %v2062_v11 = vmax.f32 %v5091_v2, 0.0  ;;  %v2064_v12 = vmax.f32 %v5093_v4, 0.0  ;;  %v5740_v0 = vld [vmem:[#allocation13 + $0x360] ss:$16 sps:$4 sm:$0xff]   ;;  %v5743_v1 = vld [vmem:[#allocation13 + $0x368] ss:$16 sps:$4 sm:$0xff]  }
 0x3a4   : > { %v2065_v17 = vpack.c.bf16 %v2061_v8, %v2061_v8  ;;  %v5748_v2 = vld [vmem:[#allocation13 + $0x384] ss:$16 sps:$4 sm:$0xff]   ;;  %v5751_v4 = vld [vmem:[#allocation13 + $0x38c] ss:$16 sps:$4 sm:$0xff]   ;;  %v5746_v5 = vld [vmem:[#allocation13 + $0x380] ss:$16 sps:$4 sm:$0xff]  }
 0x3a5   : > { %v2066_v13 = vpack.c.bf16 %v2062_v11, %v2062_v11  ;;  %v2068_v20 = vpack.c.bf16 %v2064_v12, %v2064_v12  ;;  %v5749_v7 = vld [vmem:[#allocation13 + $0x388] ss:$16 sps:$4 sm:$0xff]   ;;  %v5754_v8 = vld [vmem:[#allocation13 + $0x3a4] ss:$16 sps:$4 sm:$0xff]   ;;  %v5757_v9 = vld [vmem:[#allocation13 + $0x3ac] ss:$16 sps:$4 sm:$0xff]   ;;  %v1248_v12 = vrot.slane %v6991_v56, %v6987_v31 }
 0x3a6   : > { %v5752_v10 = vld [vmem:[#allocation13 + $0x3a0] ss:$16 sps:$4 sm:$0xff]   ;;  %v5755_v11 = vld [vmem:[#allocation13 + $0x3a8] ss:$16 sps:$4 sm:$0xff]  }
 0x3a7   : > { %2891 = vmatprep.mubr.bf16.mxu0 %v2066_v13  ;;  %2973 = vmatprep.mubr.bf16.mxu1 %v2066_v13  ;;  %v5760_v13 = vld [vmem:[#allocation13 + $0x3c4] ss:$16 sps:$4 sm:$0xff]   ;;  %v5772_v56 = vld [vmem:[#allocation16 + $0x4] ss:$16 sps:$4 sm:$0xff]  }
 0x3a8   : > { %2892 = vmatmul.mubr.bf16.vlgmr.msra.gmra.mrb[4].mxu0 %v2065_v17  ;;  %2974 = vmatmul.mubr.bf16.vlgmr.msra.gmra.mrb[4].mxu1 %v2065_v17  ;;  %v5761_v17 = vld [vmem:[#allocation13 + $0x3c8] ss:$16 sps:$4 sm:$0xff]  }
 0x3a9   : > { %2901 = vmatpush1.bf16.msra.mxu0 %v5674_v15  ;;  %2983 = vmatpush1.bf16.msra.mxu1 %v5677_v16  ;;  %v5763_v15 = vld [vmem:[#allocation13 + $0x3cc] ss:$16 sps:$4 sm:$0xff]   ;;  %v5758_v16 = vld [vmem:[#allocation13 + $0x3c0] ss:$16 sps:$4 sm:$0xff]  }
 0x3aa   : > { %2932 = vmatprep.mubr.bf16.mxu0 %v2068_v20  ;;  %3014 = vmatprep.mubr.bf16.mxu1 %v2068_v20  ;;  %v5769_v20 = vld [vmem:[#allocation13 + $0x3ec] ss:$16 sps:$4 sm:$0xff]  }
 0x3ab   : > { %2902 = vmatprep.subr.bf16.mxu0 %v5682_v18  ;;  %2984 = vmatprep.subr.bf16.mxu1 %v5685_v19  ;;  %v5092_v18 = vadd.f32 %v6999_v61, %v1248_v12  ;;  %v5766_v19 = vld [vmem:[#allocation13 + $0x3e4] ss:$16 sps:$4 sm:$0xff]   ;;  %v5778_v61 = vld [vmem:[#allocation16 + $0x24] ss:$16 sps:$4 sm:$0xff]  }
 0x3ac   : > { %v5844_v12 = vld [vmem:[#allocation16 + $0x184] ss:$16 sps:$4 sm:$0xff]  }
 0x3ad   : > { %2903 = vmatpush1.bf16.msra.mxu0 %v5680_v21  ;;  %2985 = vmatpush1.bf16.msra.mxu1 %v5683_v22  ;;  %v5764_v21 = vld [vmem:[#allocation13 + $0x3e0] ss:$16 sps:$4 sm:$0xff]   ;;  %v5767_v22 = vld [vmem:[#allocation13 + $0x3e8] ss:$16 sps:$4 sm:$0xff]  }
 0x3ae   : > { %2904 = vmatprep.subr.bf16.mxu0 %v5688_v23  ;;  %2986 = vmatprep.subr.bf16.mxu1 %v5691_v24  ;;  %v2063_v23 = vmax.f32 %v5092_v18, 0.0  ;;  %v5775_v24 = vld [vmem:[#allocation16 + $0xc] ss:$16 sps:$4 sm:$0xff]  }
 0x3af   : > { %v5853_v18 = vld [vmem:[#allocation16 + $0x1ac] ss:$16 sps:$4 sm:$0xff]  }
 0x3b1   : > { %2905 = vmatpush1.bf16.msra.mxu0 %v5686_v25  ;;  %2987 = vmatpush1.bf16.msra.mxu1 %v5689_v26  ;;  %v5770_v25 = vld [vmem:[#allocation16] ss:$16 sps:$4 sm:$0xff]   ;;  %v5773_v26 = vld [vmem:[#allocation16 + $0x8] ss:$16 sps:$4 sm:$0xff]  }
 0x3b2   : > { %2906 = vmatprep.subr.bf16.mxu0 %v5694_v27  ;;  %2988 = vmatprep.subr.bf16.mxu1 %v5697_v28  ;;  %v2067_v27 = vpack.c.bf16 %v2063_v23, %v2063_v23  ;;  %v5781_v28 = vld [vmem:[#allocation16 + $0x2c] ss:$16 sps:$4 sm:$0xff]   ;;  %v5854_v23 = vld [vmem:[#allocation16 + $0x1c0] ss:$16 sps:$4 sm:$0xff]  }
 0x3b5   : > { %2907 = vmatpush1.bf16.msra.mxu0 %v5692_v29  ;;  %2989 = vmatpush1.bf16.msra.mxu1 %v5695_v30  ;;  %v5776_v29 = vld [vmem:[#allocation16 + $0x20] ss:$16 sps:$4 sm:$0xff]   ;;  %v5779_v30 = vld [vmem:[#allocation16 + $0x28] ss:$16 sps:$4 sm:$0xff]  }
 0x3b6   : > { %2908 = vmatprep.subr.bf16.mxu0 %v5700_v32  ;;  %2990 = vmatprep.subr.bf16.mxu1 %v5703_v33  ;;  %v5784_v32 = vld [vmem:[#allocation16 + $0x44] ss:$16 sps:$4 sm:$0xff]   ;;  %v5787_v33 = vld [vmem:[#allocation16 + $0x4c] ss:$16 sps:$4 sm:$0xff]  }
 0x3b9   : > { %2909 = vmatpush1.bf16.msra.mxu0 %v5698_v34  ;;  %2991 = vmatpush1.bf16.msra.mxu1 %v5701_v35  ;;  %v5782_v34 = vld [vmem:[#allocation16 + $0x40] ss:$16 sps:$4 sm:$0xff]   ;;  %v5785_v35 = vld [vmem:[#allocation16 + $0x48] ss:$16 sps:$4 sm:$0xff]  }
 0x3ba   : > { %2910 = vmatprep.subr.bf16.mxu0 %v5706_v36  ;;  %2992 = vmatprep.subr.bf16.mxu1 %v5709_v37  ;;  %v5790_v36 = vld [vmem:[#allocation16 + $0x64] ss:$16 sps:$4 sm:$0xff]   ;;  %v5793_v37 = vld [vmem:[#allocation16 + $0x6c] ss:$16 sps:$4 sm:$0xff]  }
 0x3bd   : > { %2911 = vmatpush1.bf16.msra.mxu0 %v5704_v38  ;;  %2993 = vmatpush1.bf16.msra.mxu1 %v5707_v39  ;;  %v5788_v38 = vld [vmem:[#allocation16 + $0x60] ss:$16 sps:$4 sm:$0xff]   ;;  %v5791_v39 = vld [vmem:[#allocation16 + $0x68] ss:$16 sps:$4 sm:$0xff]  }
 0x3be   : > { %2912 = vmatprep.subr.bf16.mxu0 %v5712_v62  ;;  %2994 = vmatprep.subr.bf16.mxu1 %v5715_v40  ;;  %v5796_v62 = vld [vmem:[#allocation16 + $0x84] ss:$16 sps:$4 sm:$0xff]   ;;  %v5799_v40 = vld [vmem:[#allocation16 + $0x8c] ss:$16 sps:$4 sm:$0xff]  }
 0x3c1   : > { %2913 = vmatpush1.bf16.msra.mxu0 %v5710_v41  ;;  %2995 = vmatpush1.bf16.msra.mxu1 %v5713_v42  ;;  %v5794_v41 = vld [vmem:[#allocation16 + $0x80] ss:$16 sps:$4 sm:$0xff]   ;;  %v5797_v42 = vld [vmem:[#allocation16 + $0x88] ss:$16 sps:$4 sm:$0xff]  }
 0x3c2   : > { %2914 = vmatprep.subr.bf16.mxu0 %v5718_v43  ;;  %2996 = vmatprep.subr.bf16.mxu1 %v5721_v44  ;;  %v5802_v43 = vld [vmem:[#allocation16 + $0xa4] ss:$16 sps:$4 sm:$0xff]   ;;  %v5805_v44 = vld [vmem:[#allocation16 + $0xac] ss:$16 sps:$4 sm:$0xff]  }
 0x3c5   : > { %2915 = vmatpush1.bf16.msra.mxu0 %v5716_v45  ;;  %2997 = vmatpush1.bf16.msra.mxu1 %v5719_v46  ;;  %v5800_v45 = vld [vmem:[#allocation16 + $0xa0] ss:$16 sps:$4 sm:$0xff]   ;;  %v5803_v46 = vld [vmem:[#allocation16 + $0xa8] ss:$16 sps:$4 sm:$0xff]  }
 0x3c6   : > { %2916 = vmatprep.subr.bf16.mxu0 %v5724_v47  ;;  %2998 = vmatprep.subr.bf16.mxu1 %v5727_v6  ;;  %v5808_v47 = vld [vmem:[#allocation16 + $0xc4] ss:$16 sps:$4 sm:$0xff]   ;;  %v5811_v6 = vld [vmem:[#allocation16 + $0xcc] ss:$16 sps:$4 sm:$0xff]  }
 0x3c9   : > { %2917 = vmatpush1.bf16.msra.mxu0 %v5722_v48  ;;  %2999 = vmatpush1.bf16.msra.mxu1 %v5725_v49  ;;  %v5806_v48 = vld [vmem:[#allocation16 + $0xc0] ss:$16 sps:$4 sm:$0xff]   ;;  %v5809_v49 = vld [vmem:[#allocation16 + $0xc8] ss:$16 sps:$4 sm:$0xff]  }
 0x3ca   : > { %2918 = vmatprep.subr.bf16.mxu0 %v5730_v50  ;;  %3000 = vmatprep.subr.bf16.mxu1 %v5733_v51  ;;  %v5814_v50 = vld [vmem:[#allocation16 + $0xe4] ss:$16 sps:$4 sm:$0xff]   ;;  %v5817_v51 = vld [vmem:[#allocation16 + $0xec] ss:$16 sps:$4 sm:$0xff]  }
 0x3cd   : > { %2919 = vmatpush1.bf16.msra.mxu0 %v5728_v52  ;;  %3001 = vmatpush1.bf16.msra.mxu1 %v5731_v53  ;;  %v5812_v52 = vld [vmem:[#allocation16 + $0xe0] ss:$16 sps:$4 sm:$0xff]   ;;  %v5815_v53 = vld [vmem:[#allocation16 + $0xe8] ss:$16 sps:$4 sm:$0xff]  }
 0x3ce   : > { %2920 = vmatprep.subr.bf16.mxu0 %v5736_v55  ;;  %3002 = vmatprep.subr.bf16.mxu1 %v5739_v57  ;;  %v5820_v55 = vld [vmem:[#allocation16 + $0x104] ss:$16 sps:$4 sm:$0xff]   ;;  %v5823_v57 = vld [vmem:[#allocation16 + $0x10c] ss:$16 sps:$4 sm:$0xff]  }
 0x3d1   : > { %2921 = vmatpush1.bf16.msra.mxu0 %v5734_v58  ;;  %3003 = vmatpush1.bf16.msra.mxu1 %v5737_v59  ;;  %v5818_v58 = vld [vmem:[#allocation16 + $0x100] ss:$16 sps:$4 sm:$0xff]   ;;  %v5821_v59 = vld [vmem:[#allocation16 + $0x108] ss:$16 sps:$4 sm:$0xff]  }
 0x3d2   : > { %2922 = vmatprep.subr.bf16.mxu0 %v5742_v60  ;;  %3004 = vmatprep.subr.bf16.mxu1 %v5745_v63  ;;  %v5826_v60 = vld [vmem:[#allocation16 + $0x124] ss:$16 sps:$4 sm:$0xff]   ;;  %v5829_v63 = vld [vmem:[#allocation16 + $0x12c] ss:$16 sps:$4 sm:$0xff]  }
 0x3d5   : > { %2923 = vmatpush1.bf16.msra.mxu0 %v5740_v0  ;;  %3005 = vmatpush1.bf16.msra.mxu1 %v5743_v1  ;;  %v5824_v0 = vld [vmem:[#allocation16 + $0x120] ss:$16 sps:$4 sm:$0xff]   ;;  %v5827_v1 = vld [vmem:[#allocation16 + $0x128] ss:$16 sps:$4 sm:$0xff]  }
 0x3d6   : > { %2924 = vmatprep.subr.bf16.mxu0 %v5748_v2  ;;  %3006 = vmatprep.subr.bf16.mxu1 %v5751_v4  ;;  %v5832_v2 = vld [vmem:[#allocation16 + $0x144] ss:$16 sps:$4 sm:$0xff]   ;;  %v5835_v4 = vld [vmem:[#allocation16 + $0x14c] ss:$16 sps:$4 sm:$0xff]  }
 0x3d9   : > { %2925 = vmatpush1.bf16.msra.mxu0 %v5746_v5  ;;  %3007 = vmatpush1.bf16.msra.mxu1 %v5749_v7  ;;  %v5830_v5 = vld [vmem:[#allocation16 + $0x140] ss:$16 sps:$4 sm:$0xff]   ;;  %v5833_v7 = vld [vmem:[#allocation16 + $0x148] ss:$16 sps:$4 sm:$0xff]  }
 0x3da   : > { %2926 = vmatprep.subr.bf16.mxu0 %v5754_v8  ;;  %3008 = vmatprep.subr.bf16.mxu1 %v5757_v9  ;;  %v5838_v8 = vld [vmem:[#allocation16 + $0x164] ss:$16 sps:$4 sm:$0xff]   ;;  %v5841_v9 = vld [vmem:[#allocation16 + $0x16c] ss:$16 sps:$4 sm:$0xff]  }
 0x3dd   : > { %2927 = vmatpush1.bf16.msra.mxu0 %v5752_v10  ;;  %3009 = vmatpush1.bf16.msra.mxu1 %v5755_v11  ;;  %v5836_v10 = vld [vmem:[#allocation16 + $0x160] ss:$16 sps:$4 sm:$0xff]   ;;  %v5839_v11 = vld [vmem:[#allocation16 + $0x168] ss:$16 sps:$4 sm:$0xff]  }
 0x3de   : > { %2928 = vmatprep.subr.bf16.mxu0 %v5760_v13  ;;  %3010 = vmatprep.subr.bf16.mxu1 %v5763_v15  ;;  %v5847_v13 = vld [vmem:[#allocation16 + $0x18c] ss:$16 sps:$4 sm:$0xff]   ;;  %v5842_v15 = vld [vmem:[#allocation16 + $0x180] ss:$16 sps:$4 sm:$0xff]  }
 0x3e1   : > { %2929 = vmatpush1.bf16.msra.mxu0 %v5758_v16  ;;  %3011 = vmatpush1.bf16.msra.mxu1 %v5761_v17  ;;  %v5845_v16 = vld [vmem:[#allocation16 + $0x188] ss:$16 sps:$4 sm:$0xff]   ;;  %v5850_v17 = vld [vmem:[#allocation16 + $0x1a4] ss:$16 sps:$4 sm:$0xff]  }
 0x3e2   : > { %2930 = vmatprep.subr.bf16.mxu0 %v5766_v19  ;;  %3012 = vmatprep.subr.bf16.mxu1 %v5769_v20  ;;  %v5848_v19 = vld [vmem:[#allocation16 + $0x1a0] ss:$16 sps:$4 sm:$0xff]   ;;  %v5851_v20 = vld [vmem:[#allocation16 + $0x1a8] ss:$16 sps:$4 sm:$0xff]  }
 0x3e5   : > { %2931 = vmatpush1.bf16.msra.mxu0 %v5764_v21  ;;  %3013 = vmatpush1.bf16.msra.mxu1 %v5767_v22  ;;  %v5856_v21 = vld [vmem:[#allocation16 + $0x1c4] ss:$16 sps:$4 sm:$0xff]   ;;  %v5859_v22 = vld [vmem:[#allocation16 + $0x1cc] ss:$16 sps:$4 sm:$0xff]  }
 0x3e6   : > { %3821 = vmatprep.subr.bf16.mxu0 %v5772_v56  ;;  %3903 = vmatprep.subr.bf16.mxu1 %v5775_v24  ;;  %v5857_v56 = vld [vmem:[#allocation16 + $0x1c8] ss:$16 sps:$4 sm:$0xff]   ;;  %v5862_v24 = vld [vmem:[#allocation16 + $0x1e4] ss:$16 sps:$4 sm:$0xff]  }
 0x3e8   : > { %2933 = vmatmul.mubr.bf16.vlgmr.msra.gmra.mrb[4].mxu0 %v2067_v27  ;;  %3015 = vmatmul.mubr.bf16.vlgmr.msra.gmra.mrb[4].mxu1 %v2067_v27  ;;  %v5863_v27 = vld [vmem:[#allocation16 + $0x1e8] ss:$16 sps:$4 sm:$0xff]  }
 0x3e9   : > { %3822 = vmatpush1.bf16.msra.mxu0 %v5770_v25  ;;  %3904 = vmatpush1.bf16.msra.mxu1 %v5773_v26  ;;  %v5865_v25 = vld [vmem:[#allocation16 + $0x1ec] ss:$16 sps:$4 sm:$0xff]   ;;  %v5860_v26 = vld [vmem:[#allocation16 + $0x1e0] ss:$16 sps:$4 sm:$0xff]  }
 0x3ea   : > { %3823 = vmatprep.subr.bf16.mxu0 %v5778_v61  ;;  %3905 = vmatprep.subr.bf16.mxu1 %v5781_v28  ;;  %v5868_v61 = vld [vmem:[#allocation16 + $0x204] ss:$16 sps:$4 sm:$0xff]   ;;  %v5871_v28 = vld [vmem:[#allocation16 + $0x20c] ss:$16 sps:$4 sm:$0xff]  }
 0x3ed   : > { %3824 = vmatpush1.bf16.msra.mxu0 %v5776_v29  ;;  %3906 = vmatpush1.bf16.msra.mxu1 %v5779_v30  ;;  %v7004_v29 = vld [vmem:[#allocation15] sm:$0xf] }
 0x3ee   : > { %3825 = vmatprep.subr.bf16.mxu0 %v5784_v32  ;;  %3907 = vmatprep.subr.bf16.mxu1 %v5787_v33  ;;  %v2202_v30 = vrot.slane %v7004_v29, %v6977_v14  ;;  %v2206_v32 = vrot.slane %v7004_v29, %v6970_v3  ;;  %v2214_v33 = vrot.slane %v7004_v29, %v6982_v54 }
 0x3f1   : > { %3826 = vmatpush1.bf16.msra.mxu0 %v5782_v34  ;;  %3908 = vmatpush1.bf16.msra.mxu1 %v5785_v35 }
 0x3f2   : > { %3827 = vmatprep.subr.bf16.mxu0 %v5790_v36  ;;  %3909 = vmatprep.subr.bf16.mxu1 %v5793_v37 }
 0x3f5   : > { %3828 = vmatpush1.bf16.msra.mxu0 %v5788_v38  ;;  %3910 = vmatpush1.bf16.msra.mxu1 %v5791_v39 }
 0x3f6   : > { %3829 = vmatprep.subr.bf16.mxu0 %v5796_v62  ;;  %3911 = vmatprep.subr.bf16.mxu1 %v5799_v40 }
 0x3f9   : > { %3830 = vmatpush1.bf16.msra.mxu0 %v5794_v41  ;;  %3912 = vmatpush1.bf16.msra.mxu1 %v5797_v42 }
 0x3fa   : > { %3831 = vmatprep.subr.bf16.mxu0 %v5802_v43  ;;  %3913 = vmatprep.subr.bf16.mxu1 %v5805_v44 }
 0x3fd   : > { %3832 = vmatpush1.bf16.msra.mxu0 %v5800_v45  ;;  %3914 = vmatpush1.bf16.msra.mxu1 %v5803_v46 }
 0x3fe   : > { %3833 = vmatprep.subr.bf16.mxu0 %v5808_v47  ;;  %3915 = vmatprep.subr.bf16.mxu1 %v5811_v6  ;;  %v5866_v6 = vld [vmem:[#allocation16 + $0x200] ss:$16 sps:$4 sm:$0xff]  }
 0x401   : > { %3834 = vmatpush1.bf16.msra.mxu0 %v5806_v48  ;;  %3916 = vmatpush1.bf16.msra.mxu1 %v5809_v49  ;;  %v5869_v48 = vld [vmem:[#allocation16 + $0x208] ss:$16 sps:$4 sm:$0xff]  }
 0x402   : > { %3835 = vmatprep.subr.bf16.mxu0 %v5814_v50  ;;  %3917 = vmatprep.subr.bf16.mxu1 %v5817_v51  ;;  %v5874_v50 = vld [vmem:[#allocation16 + $0x224] ss:$16 sps:$4 sm:$0xff]   ;;  %v5877_v51 = vld [vmem:[#allocation16 + $0x22c] ss:$16 sps:$4 sm:$0xff]  }
 0x405   : > { %3836 = vmatpush1.bf16.msra.mxu0 %v5812_v52  ;;  %3918 = vmatpush1.bf16.msra.mxu1 %v5815_v53  ;;  %v5872_v53 = vld [vmem:[#allocation16 + $0x220] ss:$16 sps:$4 sm:$0xff]  }
 0x406   : > { %3837 = vmatprep.subr.bf16.mxu0 %v5820_v55  ;;  %3919 = vmatprep.subr.bf16.mxu1 %v5823_v57  ;;  %v5875_v55 = vld [vmem:[#allocation16 + $0x228] ss:$16 sps:$4 sm:$0xff]   ;;  %v5880_v57 = vld [vmem:[#allocation16 + $0x244] ss:$16 sps:$4 sm:$0xff]  }
 0x409   : > { %3838 = vmatpush1.bf16.msra.mxu0 %v5818_v58  ;;  %3920 = vmatpush1.bf16.msra.mxu1 %v5821_v59  ;;  %v5883_v58 = vld [vmem:[#allocation16 + $0x24c] ss:$16 sps:$4 sm:$0xff]   ;;  %v5878_v59 = vld [vmem:[#allocation16 + $0x240] ss:$16 sps:$4 sm:$0xff]  }
 0x40a   : > { %3839 = vmatprep.subr.bf16.mxu0 %v5826_v60  ;;  %3921 = vmatprep.subr.bf16.mxu1 %v5829_v63  ;;  %v5881_v60 = vld [vmem:[#allocation16 + $0x248] ss:$16 sps:$4 sm:$0xff]   ;;  %v5886_v63 = vld [vmem:[#allocation16 + $0x264] ss:$16 sps:$4 sm:$0xff]  }
 0x40d   : > { %3840 = vmatpush1.bf16.msra.mxu0 %v5824_v0  ;;  %3922 = vmatpush1.bf16.msra.mxu1 %v5827_v1  ;;  %v5889_v0 = vld [vmem:[#allocation16 + $0x26c] ss:$16 sps:$4 sm:$0xff]   ;;  %v5884_v1 = vld [vmem:[#allocation16 + $0x260] ss:$16 sps:$4 sm:$0xff]  }
 0x40e   : > { %3841 = vmatprep.subr.bf16.mxu0 %v5832_v2  ;;  %3923 = vmatprep.subr.bf16.mxu1 %v5835_v4  ;;  %v5887_v2 = vld [vmem:[#allocation16 + $0x268] ss:$16 sps:$4 sm:$0xff]   ;;  %v5892_v4 = vld [vmem:[#allocation16 + $0x284] ss:$16 sps:$4 sm:$0xff]  }
 0x411   : > { %3842 = vmatpush1.bf16.msra.mxu0 %v5830_v5  ;;  %3924 = vmatpush1.bf16.msra.mxu1 %v5833_v7  ;;  %v5895_v5 = vld [vmem:[#allocation16 + $0x28c] ss:$16 sps:$4 sm:$0xff]   ;;  %v5890_v7 = vld [vmem:[#allocation16 + $0x280] ss:$16 sps:$4 sm:$0xff]  }
 0x412   : > { %3843 = vmatprep.subr.bf16.mxu0 %v5838_v8  ;;  %3925 = vmatprep.subr.bf16.mxu1 %v5841_v9  ;;  %v5893_v8 = vld [vmem:[#allocation16 + $0x288] ss:$16 sps:$4 sm:$0xff]   ;;  %v5898_v9 = vld [vmem:[#allocation16 + $0x2a4] ss:$16 sps:$4 sm:$0xff]  }
 0x415   : > { %3844 = vmatpush1.bf16.msra.mxu0 %v5836_v10  ;;  %3926 = vmatpush1.bf16.msra.mxu1 %v5839_v11  ;;  %v5901_v10 = vld [vmem:[#allocation16 + $0x2ac] ss:$16 sps:$4 sm:$0xff]   ;;  %v5896_v11 = vld [vmem:[#allocation16 + $0x2a0] ss:$16 sps:$4 sm:$0xff]  }
 0x416   : > { %3845 = vmatprep.subr.bf16.mxu0 %v5844_v12  ;;  %3927 = vmatprep.subr.bf16.mxu1 %v5847_v13  ;;  %v5899_v12 = vld [vmem:[#allocation16 + $0x2a8] ss:$16 sps:$4 sm:$0xff]   ;;  %v5904_v13 = vld [vmem:[#allocation16 + $0x2c4] ss:$16 sps:$4 sm:$0xff]  }
 0x419   : > { %3846 = vmatpush1.bf16.msra.mxu0 %v5842_v15  ;;  %3928 = vmatpush1.bf16.msra.mxu1 %v5845_v16  ;;  %v5907_v15 = vld [vmem:[#allocation16 + $0x2cc] ss:$16 sps:$4 sm:$0xff]   ;;  %v5902_v16 = vld [vmem:[#allocation16 + $0x2c0] ss:$16 sps:$4 sm:$0xff]  }
 0x41a   : > { %3847 = vmatprep.subr.bf16.mxu0 %v5850_v17  ;;  %3929 = vmatprep.subr.bf16.mxu1 %v5853_v18  ;;  %v5905_v17 = vld [vmem:[#allocation16 + $0x2c8] ss:$16 sps:$4 sm:$0xff]   ;;  %v5910_v18 = vld [vmem:[#allocation16 + $0x2e4] ss:$16 sps:$4 sm:$0xff]  }
 0x41d   : > { %3848 = vmatpush1.bf16.msra.mxu0 %v5848_v19  ;;  %3930 = vmatpush1.bf16.msra.mxu1 %v5851_v20  ;;  %v5913_v19 = vld [vmem:[#allocation16 + $0x2ec] ss:$16 sps:$4 sm:$0xff]   ;;  %v5908_v20 = vld [vmem:[#allocation16 + $0x2e0] ss:$16 sps:$4 sm:$0xff]  }
 0x41e   : > { %3849 = vmatprep.subr.bf16.mxu0 %v5856_v21  ;;  %3931 = vmatprep.subr.bf16.mxu1 %v5859_v22  ;;  %v5911_v21 = vld [vmem:[#allocation16 + $0x2e8] ss:$16 sps:$4 sm:$0xff]   ;;  %v5916_v22 = vld [vmem:[#allocation16 + $0x304] ss:$16 sps:$4 sm:$0xff]  }
 0x421   : > { %3850 = vmatpush1.bf16.msra.mxu0 %v5854_v23  ;;  %3932 = vmatpush1.bf16.msra.mxu1 %v5857_v56  ;;  %v5919_v23 = vld [vmem:[#allocation16 + $0x30c] ss:$16 sps:$4 sm:$0xff]   ;;  %v5914_v56 = vld [vmem:[#allocation16 + $0x300] ss:$16 sps:$4 sm:$0xff]  }
 0x422   : > { %3851 = vmatprep.subr.bf16.mxu0 %v5862_v24  ;;  %3933 = vmatprep.subr.bf16.mxu1 %v5865_v25  ;;  %v5917_v24 = vld [vmem:[#allocation16 + $0x308] ss:$16 sps:$4 sm:$0xff]   ;;  %v5922_v25 = vld [vmem:[#allocation16 + $0x324] ss:$16 sps:$4 sm:$0xff]  }
 0x425   : > { %3852 = vmatpush1.bf16.msra.mxu0 %v5860_v26  ;;  %3934 = vmatpush1.bf16.msra.mxu1 %v5863_v27  ;;  %v5925_v26 = vld [vmem:[#allocation16 + $0x32c] ss:$16 sps:$4 sm:$0xff]   ;;  %v5920_v27 = vld [vmem:[#allocation16 + $0x320] ss:$16 sps:$4 sm:$0xff]  }
 0x426   : > { %3862 = vmatprep.subr.bf16.mxu0 %v5868_v61  ;;  %3944 = vmatprep.subr.bf16.mxu1 %v5871_v28  ;;  %v5923_v61 = vld [vmem:[#allocation16 + $0x328] ss:$16 sps:$4 sm:$0xff]   ;;  %v5928_v28 = vld [vmem:[#allocation16 + $0x344] ss:$16 sps:$4 sm:$0xff]  }
 0x4bb   : > { %v2934_v34 = vpop.f32.mrb[4].mxu0  ;;  %v7012_v35 = vpop.f32.mrb[4].mxu1 }
 0x4bc   : > { %v5094_v36 = vadd.f32 %v2934_v34, %v2202_v30  ;;  %v2936_v37 = vpop.f32.mrb[5].mxu0  ;;  %v3018_v38 = vpop.f32.mrb[5].mxu1  ;;  %v5931_v30 = vld [vmem:[#allocation16 + $0x34c] ss:$16 sps:$4 sm:$0xff]   ;;  %v5934_v34 = vld [vmem:[#allocation16 + $0x364] ss:$16 sps:$4 sm:$0xff]  }
 0x4bd   : > { %v5095_v39 = vadd.f32 %v2936_v37, %v2206_v32  ;;  %v5097_v62 = vadd.f32 %v3018_v38, %v2214_v33  ;;  %v2938_v40 = vpop.f32.mrb[6].mxu0  ;;  %v3020_v41 = vpop.f32.mrb[6].mxu1  ;;  %v5926_v32 = vld [vmem:[#allocation16 + $0x340] ss:$16 sps:$4 sm:$0xff]   ;;  %v5929_v33 = vld [vmem:[#allocation16 + $0x348] ss:$16 sps:$4 sm:$0xff]  }
 0x4be   : > { %v3023_v42 = vmax.f32 %v5094_v36, 0.0  ;;  %v2939_v43 = vpop.f32.mrb[7].mxu0  ;;  %v3021_v44 = vpop.f32.mrb[7].mxu1  ;;  %v5937_v36 = vld [vmem:[#allocation16 + $0x36c] ss:$16 sps:$4 sm:$0xff]  }
 0x4bf   : > { %v3024_v45 = vmax.f32 %v5095_v39, 0.0  ;;  %v3026_v46 = vmax.f32 %v5097_v62, 0.0  ;;  %v5932_v37 = vld [vmem:[#allocation16 + $0x360] ss:$16 sps:$4 sm:$0xff]   ;;  %v5935_v38 = vld [vmem:[#allocation16 + $0x368] ss:$16 sps:$4 sm:$0xff]  }
 0x4c0   : > { %v3027_v49 = vpack.c.bf16 %v3023_v42, %v3023_v42  ;;  %v5940_v39 = vld [vmem:[#allocation16 + $0x384] ss:$16 sps:$4 sm:$0xff]   ;;  %v5943_v62 = vld [vmem:[#allocation16 + $0x38c] ss:$16 sps:$4 sm:$0xff]   ;;  %v5938_v40 = vld [vmem:[#allocation16 + $0x380] ss:$16 sps:$4 sm:$0xff]  }
 0x4c1   : > { %v3028_v47 = vpack.c.bf16 %v3024_v45, %v3024_v45  ;;  %v3030_v52 = vpack.c.bf16 %v3026_v46, %v3026_v46  ;;  %v5941_v41 = vld [vmem:[#allocation16 + $0x388] ss:$16 sps:$4 sm:$0xff]   ;;  %v5946_v42 = vld [vmem:[#allocation16 + $0x3a4] ss:$16 sps:$4 sm:$0xff]   ;;  %v5949_v43 = vld [vmem:[#allocation16 + $0x3ac] ss:$16 sps:$4 sm:$0xff]   ;;  %v2210_v46 = vrot.slane %v7004_v29, %v6987_v31 }
 0x4c2   : > { %v5944_v44 = vld [vmem:[#allocation16 + $0x3a0] ss:$16 sps:$4 sm:$0xff]   ;;  %v5947_v45 = vld [vmem:[#allocation16 + $0x3a8] ss:$16 sps:$4 sm:$0xff]  }
 0x4c3   : > { %3853 = vmatprep.mubr.bf16.mxu0 %v3028_v47  ;;  %3935 = vmatprep.mubr.bf16.mxu1 %v3028_v47  ;;  %v5952_v47 = vld [vmem:[#allocation16 + $0x3c4] ss:$16 sps:$4 sm:$0xff]  }
 0x4c4   : > { %3854 = vmatmul.mubr.bf16.vlgmr.msra.gmra.mrb[8].mxu0 %v3027_v49  ;;  %3936 = vmatmul.mubr.bf16.vlgmr.msra.gmra.mrb[8].mxu1 %v3027_v49  ;;  %v5953_v49 = vld [vmem:[#allocation16 + $0x3c8] ss:$16 sps:$4 sm:$0xff]  }
 0x4c5   : > { %3863 = vmatpush1.bf16.msra.mxu0 %v5866_v6  ;;  %3945 = vmatpush1.bf16.msra.mxu1 %v5869_v48  ;;  %v5955_v6 = vld [vmem:[#allocation16 + $0x3cc] ss:$16 sps:$4 sm:$0xff]   ;;  %v5950_v48 = vld [vmem:[#allocation16 + $0x3c0] ss:$16 sps:$4 sm:$0xff]   ;;  %v5962_v29 = vld [vmem:[#allocation19 + $0x40] sm:$0xff]  }
 0x4c6   : > { %3894 = vmatprep.mubr.bf16.mxu0 %v3030_v52  ;;  %3976 = vmatprep.mubr.bf16.mxu1 %v3030_v52  ;;  %v5961_v52 = vld [vmem:[#allocation16 + $0x3ec] ss:$16 sps:$4 sm:$0xff]  }
 0x4c7   : > { %3864 = vmatprep.subr.bf16.mxu0 %v5874_v50  ;;  %3946 = vmatprep.subr.bf16.mxu1 %v5877_v51  ;;  %v5096_v50 = vadd.f32 %v7012_v35, %v2210_v46  ;;  %v5958_v51 = vld [vmem:[#allocation16 + $0x3e4] ss:$16 sps:$4 sm:$0xff]   ;;  %v5966_v35 = vld [vmem:[#allocation19 + $0x48] sm:$0xff]  }
 0x4c9   : > { %3865 = vmatpush1.bf16.msra.mxu0 %v5872_v53  ;;  %3947 = vmatpush1.bf16.msra.mxu1 %v5875_v55  ;;  %v5956_v53 = vld [vmem:[#allocation16 + $0x3e0] ss:$16 sps:$4 sm:$0xff]   ;;  %v5959_v55 = vld [vmem:[#allocation16 + $0x3e8] ss:$16 sps:$4 sm:$0xff]  }
 0x4ca   : > { %3866 = vmatprep.subr.bf16.mxu0 %v5880_v57  ;;  %3948 = vmatprep.subr.bf16.mxu1 %v5883_v58  ;;  %v3025_v57 = vmax.f32 %v5096_v50, 0.0  ;;  %v5963_v58 = vld [vmem:[#allocation19 + $0xc0] sm:$0xff]  }
 0x4cd   : > { %3867 = vmatpush1.bf16.msra.mxu0 %v5878_v59  ;;  %3949 = vmatpush1.bf16.msra.mxu1 %v5881_v60  ;;  %v5964_v59 = vld [vmem:[#allocation19] sm:$0xff]  }
 0x4ce   : > { %3868 = vmatprep.subr.bf16.mxu0 %v5886_v63  ;;  %3950 = vmatprep.subr.bf16.mxu1 %v5889_v0  ;;  %v5965_v60 = vld [vmem:[#allocation19 + $0x80] sm:$0xff]   ;;  %v3029_v63 = vpack.c.bf16 %v3025_v57, %v3025_v57  ;;  %v5967_v0 = vld [vmem:[#allocation19 + $0xc8] sm:$0xff]  }
 0x4d1   : > { %3869 = vmatpush1.bf16.msra.mxu0 %v5884_v1  ;;  %3951 = vmatpush1.bf16.msra.mxu1 %v5887_v2  ;;  %v5968_v1 = vld [vmem:[#allocation19 + $0x8] sm:$0xff]  }
 0x4d2   : > { %3870 = vmatprep.subr.bf16.mxu0 %v5892_v4  ;;  %3952 = vmatprep.subr.bf16.mxu1 %v5895_v5  ;;  %v5969_v2 = vld [vmem:[#allocation19 + $0x88] sm:$0xff]   ;;  %v5970_v4 = vld [vmem:[#allocation19 + $0x50] sm:$0xff]  }
 0x4d3   : > { %v5971_v5 = vld [vmem:[#allocation19 + $0xd0] sm:$0xff]  }
 0x4d5   : > { %3871 = vmatpush1.bf16.msra.mxu0 %v5890_v7  ;;  %3953 = vmatpush1.bf16.msra.mxu1 %v5893_v8  ;;  %v5972_v7 = vld [vmem:[#allocation19 + $0x10] sm:$0xff]  }
 0x4d6   : > { %3872 = vmatprep.subr.bf16.mxu0 %v5898_v9  ;;  %3954 = vmatprep.subr.bf16.mxu1 %v5901_v10  ;;  %v5973_v8 = vld [vmem:[#allocation19 + $0x90] sm:$0xff]   ;;  %v5974_v9 = vld [vmem:[#allocation19 + $0x58] sm:$0xff]  }
 0x4d7   : > { %v5975_v10 = vld [vmem:[#allocation19 + $0xd8] sm:$0xff]  }
 0x4d9   : > { %3873 = vmatpush1.bf16.msra.mxu0 %v5896_v11  ;;  %3955 = vmatpush1.bf16.msra.mxu1 %v5899_v12  ;;  %v5976_v11 = vld [vmem:[#allocation19 + $0x18] sm:$0xff]  }
 0x4da   : > { %3874 = vmatprep.subr.bf16.mxu0 %v5904_v13  ;;  %3956 = vmatprep.subr.bf16.mxu1 %v5907_v15  ;;  %v5977_v12 = vld [vmem:[#allocation19 + $0x98] sm:$0xff]   ;;  %v5978_v13 = vld [vmem:[#allocation19 + $0x60] sm:$0xff]  }
 0x4db   : > { %v5979_v15 = vld [vmem:[#allocation19 + $0xe0] sm:$0xff]  }
 0x4dd   : > { %3875 = vmatpush1.bf16.msra.mxu0 %v5902_v16  ;;  %3957 = vmatpush1.bf16.msra.mxu1 %v5905_v17  ;;  %v5980_v16 = vld [vmem:[#allocation19 + $0x20] sm:$0xff]  }
 0x4de   : > { %3876 = vmatprep.subr.bf16.mxu0 %v5910_v18  ;;  %3958 = vmatprep.subr.bf16.mxu1 %v5913_v19  ;;  %v5981_v17 = vld [vmem:[#allocation19 + $0xa0] sm:$0xff]   ;;  %v5982_v18 = vld [vmem:[#allocation19 + $0x68] sm:$0xff]  }
 0x4df   : > { %v5983_v19 = vld [vmem:[#allocation19 + $0xe8] sm:$0xff]  }
 0x4e1   : > { %3877 = vmatpush1.bf16.msra.mxu0 %v5908_v20  ;;  %3959 = vmatpush1.bf16.msra.mxu1 %v5911_v21  ;;  %v5984_v20 = vld [vmem:[#allocation19 + $0x28] sm:$0xff]  }
 0x4e2   : > { %3878 = vmatprep.subr.bf16.mxu0 %v5916_v22  ;;  %3960 = vmatprep.subr.bf16.mxu1 %v5919_v23  ;;  %v5985_v21 = vld [vmem:[#allocation19 + $0xa8] sm:$0xff]   ;;  %v5986_v22 = vld [vmem:[#allocation19 + $0x70] sm:$0xff]  }
 0x4e3   : > { %v5987_v23 = vld [vmem:[#allocation19 + $0xf0] sm:$0xff]  }
 0x4e5   : > { %3879 = vmatpush1.bf16.msra.mxu0 %v5914_v56  ;;  %3961 = vmatpush1.bf16.msra.mxu1 %v5917_v24  ;;  %v5988_v56 = vld [vmem:[#allocation19 + $0x30] sm:$0xff]  }
 0x4e6   : > { %3880 = vmatprep.subr.bf16.mxu0 %v5922_v25  ;;  %3962 = vmatprep.subr.bf16.mxu1 %v5925_v26  ;;  %v5989_v24 = vld [vmem:[#allocation19 + $0xb0] sm:$0xff]   ;;  %v5990_v25 = vld [vmem:[#allocation19 + $0x78] sm:$0xff]  }
 0x4e7   : > { %v5991_v26 = vld [vmem:[#allocation19 + $0xf8] sm:$0xff]  }
 0x4e9   : > { %3881 = vmatpush1.bf16.msra.mxu0 %v5920_v27  ;;  %3963 = vmatpush1.bf16.msra.mxu1 %v5923_v61  ;;  %v5992_v27 = vld [vmem:[#allocation19 + $0x38] sm:$0xff]  }
 0x4ea   : > { %3882 = vmatprep.subr.bf16.mxu0 %v5928_v28  ;;  %3964 = vmatprep.subr.bf16.mxu1 %v5931_v30  ;;  %v5993_v61 = vld [vmem:[#allocation19 + $0xb8] sm:$0xff]  }
 0x4eb   : > { %v3159_v28 = vld [vmem:[#allocation18] sm:$0xf] }
 0x4ec   : > { %v3164_v30 = vrot.slane %v3159_v28, %v6977_v14 }
 0x4ed   : > { %3883 = vmatpush1.bf16.msra.mxu0 %v5926_v32  ;;  %3965 = vmatpush1.bf16.msra.mxu1 %v5929_v33  ;;  %v3172_v32 = vrot.slane %v3159_v28, %v6987_v31  ;;  %v3168_v33 = vrot.slane %v3159_v28, %v6970_v3 }
 0x4ee   : > { %3884 = vmatprep.subr.bf16.mxu0 %v5934_v34  ;;  %3966 = vmatprep.subr.bf16.mxu1 %v5937_v36  ;;  %v3176_v34 = vrot.slane %v3159_v28, %v6982_v54 }
 0x4f1   : > { %3885 = vmatpush1.bf16.msra.mxu0 %v5932_v37  ;;  %3967 = vmatpush1.bf16.msra.mxu1 %v5935_v38 }
 0x4f2   : > { %3886 = vmatprep.subr.bf16.mxu0 %v5940_v39  ;;  %3968 = vmatprep.subr.bf16.mxu1 %v5943_v62 }
 0x4f5   : > { %3887 = vmatpush1.bf16.msra.mxu0 %v5938_v40  ;;  %3969 = vmatpush1.bf16.msra.mxu1 %v5941_v41 }
 0x4f6   : > { %3888 = vmatprep.subr.bf16.mxu0 %v5946_v42  ;;  %3970 = vmatprep.subr.bf16.mxu1 %v5949_v43 }
 0x4f9   : > { %3889 = vmatpush1.bf16.msra.mxu0 %v5944_v44  ;;  %3971 = vmatpush1.bf16.msra.mxu1 %v5947_v45 }
 0x4fa   : > { %3890 = vmatprep.subr.bf16.mxu0 %v5952_v47  ;;  %3972 = vmatprep.subr.bf16.mxu1 %v5955_v6 }
 0x4fd   : > { %3891 = vmatpush1.bf16.msra.mxu0 %v5950_v48  ;;  %3973 = vmatpush1.bf16.msra.mxu1 %v5953_v49 }
 0x4fe   : > { %3892 = vmatprep.subr.bf16.mxu0 %v5958_v51  ;;  %3974 = vmatprep.subr.bf16.mxu1 %v5961_v52  ;;  %v5007_v52 = vld [vmem:[#allocation21] ss:$0 sm:$0xff] }
 0x501   : > { %3893 = vmatpush1.bf16.msra.mxu0 %v5956_v53  ;;  %3975 = vmatpush1.bf16.msra.mxu1 %v5959_v55 }
 0x502   : > { %5046 = vmatprep.subr.bf16.mxu0 %v5962_v29  ;;  %5068 = vmatprep.subr.bf16.mxu1 %v5963_v58 }
 0x504   : > { %3895 = vmatmul.mubr.bf16.vlgmr.msra.gmra.mrb[8].mxu0 %v3029_v63  ;;  %3977 = vmatmul.mubr.bf16.vlgmr.msra.gmra.mrb[8].mxu1 %v3029_v63 }
 0x505   : > { %5047 = vmatpush3.bf16.msra.mxu0 %v5964_v59  ;;  %5069 = vmatpush3.bf16.msra.mxu1 %v5965_v60 }
 0x506   : > { %5048 = vmatprep.subr.bf16.mxu0 %v5966_v35  ;;  %5070 = vmatprep.subr.bf16.mxu1 %v5967_v0 }
 0x509   : > { %5049 = vmatpush3.bf16.msra.mxu0 %v5968_v1  ;;  %5071 = vmatpush3.bf16.msra.mxu1 %v5969_v2 }
 0x50a   : > { %5050 = vmatprep.subr.bf16.mxu0 %v5970_v4  ;;  %5072 = vmatprep.subr.bf16.mxu1 %v5971_v5 }
 0x50d   : > { %5051 = vmatpush3.bf16.msra.mxu0 %v5972_v7  ;;  %5073 = vmatpush3.bf16.msra.mxu1 %v5973_v8 }
 0x50e   : > { %5052 = vmatprep.subr.bf16.mxu0 %v5974_v9  ;;  %5074 = vmatprep.subr.bf16.mxu1 %v5975_v10 }
 0x511   : > { %5053 = vmatpush3.bf16.msra.mxu0 %v5976_v11  ;;  %5075 = vmatpush3.bf16.msra.mxu1 %v5977_v12 }
 0x512   : > { %5054 = vmatprep.subr.bf16.mxu0 %v5978_v13  ;;  %5076 = vmatprep.subr.bf16.mxu1 %v5979_v15 }
 0x515   : > { %5055 = vmatpush3.bf16.msra.mxu0 %v5980_v16  ;;  %5077 = vmatpush3.bf16.msra.mxu1 %v5981_v17 }
 0x516   : > { %5056 = vmatprep.subr.bf16.mxu0 %v5982_v18  ;;  %5078 = vmatprep.subr.bf16.mxu1 %v5983_v19  ;;  %v4355_v19 = vld [vmem:[#allocation6] sm:$0xff] }
 0x519   : > { %5057 = vmatpush3.bf16.msra.mxu0 %v5984_v20  ;;  %5079 = vmatpush3.bf16.msra.mxu1 %v5985_v21  ;;  %v4356_v20 = vsub.f32 1.0, %v4355_v19 }
 0x51a   : > { %5058 = vmatprep.subr.bf16.mxu0 %v5986_v22  ;;  %5080 = vmatprep.subr.bf16.mxu1 %v5987_v23 }
 0x51d   : > { %5059 = vmatpush3.bf16.msra.mxu0 %v5988_v56  ;;  %5081 = vmatpush3.bf16.msra.mxu1 %v5989_v24 }
 0x51e   : > { %5060 = vmatprep.subr.bf16.mxu0 %v5990_v25  ;;  %5082 = vmatprep.subr.bf16.mxu1 %v5991_v26 }
 0x521   : > { %5061 = vmatpush3.bf16.msra.mxu0 %v5992_v27  ;;  %5083 = vmatpush3.bf16.msra.mxu1 %v5993_v61 }
 0x5d7   : > { %v3896_v36 = vpop.f32.mrb[8].mxu0  ;;  %v3978_v37 = vpop.f32.mrb[8].mxu1 }
 0x5d8   : > { %v5098_v38 = vadd.f32 %v3896_v36, %v3164_v30  ;;  %v5100_v39 = vadd.f32 %v3978_v37, %v3172_v32  ;;  %v3898_v62 = vpop.f32.mrb[9].mxu0  ;;  %v3980_v40 = vpop.f32.mrb[9].mxu1 }
 0x5d9   : > { %v5099_v41 = vadd.f32 %v3898_v62, %v3168_v33  ;;  %v5101_v42 = vadd.f32 %v3980_v40, %v3176_v34  ;;  %v3900_v43 = vpop.f32.mrb[10].mxu0  ;;  %v3982_v44 = vpop.f32.mrb[10].mxu1 }
 0x5da   : > { %v3985_v45 = vmax.f32 %v5098_v38, 0.0  ;;  %v3987_v46 = vmax.f32 %v5100_v39, 0.0  ;;  %v3901_v47 = vpop.f32.mrb[11].mxu0  ;;  %v3983_v14 = vpop.f32.mrb[11].mxu1 }
 0x5db   : > { %v3986_v6 = vmax.f32 %v5099_v41, 0.0  ;;  %v3988_v31 = vmax.f32 %v5101_v42, 0.0 }
 0x5dc   : > { %v3989_v49 = vpack.c.bf16 %v3985_v45, %v3985_v45  ;;  %v3991_v54 = vpack.c.bf16 %v3987_v46, %v3987_v46 }
 0x5dd   : > { %v3990_v48 = vpack.c.bf16 %v3986_v6, %v3986_v6  ;;  %v3992_v3 = vpack.c.bf16 %v3988_v31, %v3988_v31 }
 0x5df   : > { %4288 = vmatprep.mubr.bf16.mxu0 %v3990_v48  ;;  %4328 = vmatprep.mubr.bf16.mxu1 %v3992_v3 }
 0x5e0   : > { %4289 = vmatmul.mubr.bf16.vlgmr.msra.gmra.mrb[12].mxu0 %v3989_v49  ;;  %4329 = vmatmul.mubr.bf16.vlgmr.msra.gmra.mrb[12].mxu1 %v3991_v54 }
 0x6b3   : > { %v5062_v50 = vpop.f32.mrb[12].mxu0  ;;  %v5084_v51 = vpop.f32.mrb[12].mxu1 }
 0x6b4   : > { %v5063_v53 = vpop.f32.mrb[13].mxu0  ;;  %v5085_v55 = vpop.f32.mrb[13].mxu1 }
 0x6b5   : > { %v5064_v57 = vadd.f32 %v5063_v53, %v5062_v50  ;;  %v5086_v29 = vadd.f32 %v5085_v55, %v5084_v51  ;;  %v5065_v58 = vpop.f32.mrb[14].mxu0  ;;  %v5087_v59 = vpop.f32.mrb[14].mxu1 }
 0x6b6   : > { %v5066_v60 = vpop.f32.mrb[15].mxu0  ;;  %v5088_v63 = vpop.f32.mrb[15].mxu1 }
 0x6b7   : > { %v4291_v35 = vadd.f32 %v5064_v57, %v5007_v52 }
 0x6b9   : > { %v4331_v0 = vadd.f32 %v5086_v29, %v4291_v35 }
 0x6bb   : > { %v4336_v1 = vand.u32 2147483647, %v4331_v0  ;;  %v4349_v15 = vmax.f32 %v4331_v0, 0.0 }
 0x6bd   : > { %v4337_v2 = vsub.f32 0.0, %v4336_v1 }
 0x6bf   : > { %v4338_v4 = vmul.f32 1.442695, %v4337_v2 }
 0x6c1   : > { %5994 = vpow2.f32 %v4338_v4 }
 0x6cb   : > { %v5995_v5 = vpop.eup %5994 }
 0x6cc   : > { %v4340_v7 = vadd.f32 1.0, %v5995_v5  ;;  %v4343_v8 = vmul.f32 -0.5, %v5995_v5  ;;  %v4346_v10 = vand.u32 2147483647, %v5995_v5 }
 0x6ce   : > { %5996 = vlog2.f32 %v4340_v7  ;;  %v4344_v9 = vadd.f32 1.0, %v4343_v8  ;;  %vm4347_vm0 = vcmp.lt.f32.partialorder %v4346_v10, 0.0004427343 }
 0x6d0   : > { %v4345_v13 = vmul.f32 %v5995_v5, %v4344_v9 }
 0x6d8   : > { %v5997_v11 = vpop.eup %5996 }
 0x6d9   : > { %v4342_v12 = vmul.f32 0.6931472, %v5997_v11 }
 0x6db   : > { %v4348_v16 = vsel %vm4347_vm0, %v4345_v13, %v4342_v12 }
 0x6dc   : > { %v4350_v17 = vadd.f32 %v4349_v15, %v4348_v16 }
 0x6de   : > { %4351 = vmax.xlane.f32.xlu0 %v4350_v17 }
 0x76b   : > { %v4352_v18 = vpop.xlane.xlu0 %4351 }
 0x76c   : > { %5998 = vrcp.f32 %v4352_v18 }
 0x776   : > { %v5999_v21 = vpop.eup %5998 }
 0x777   : > { %v4354_v22 = vmul.f32 %v5999_v21, %v4350_v17 }
 0x779   : > { %v4357_v23 = vmul.f32 %v4356_v20, %v4354_v22 }
 0x77b   : > { %4358 = vst [vmem:[#allocation22] sm:$0xff] %v4357_v23 }
 0x77c PF: > { %s7114_s28 = sld [smem:[#allocation32_spill]]  ;;  %s6449_s30 = smov [#allocation22]  }
 0x77d   : > { %s4366_s17 = sshll.u32 %s6449_s30, 4  ;;  %s4367_s17 = int_to_ptr.vmem [resolvable:$true] %s4366_s17 }
 0x77e   : > { %s6338_s19 = scalar_lea.vmem %s4367_s17, 128  ;;  %p6345_p11 = scmp.lt.s32.totalorder %s4367_s17, %s4367_s17 }
 0x77f   : > { %p6339_p1 = scmp.ne.s32.totalorder %s4367_s17, %s6338_s19  ;;  %p6346_p12 = scmp.lt.s32.totalorder %s6338_s19, %s6338_s19 }
 0x781   : > { %p6347_p0 = por %p6346_p12, %p6345_p11 }
 0x782   : > { %p5237_p3 = scmp.eq.s32.totalorder %s7114_s28, 4 }
 0x784   : > { %p6340_p6 = pnand %p6339_p1, %p5237_p3 }
 0x786   : > { %p6341_p4 = pneg %p6340_p6 }
 0x788   : > { %p6348_p5 = pnand %p6347_p0, %p6341_p4 }
 0x78a   : > { %6351 = shalt.err (!%p6348_p5)
}
 0x78b   : > { %s7115_s15 = sld [smem:[#allocation37_spill]] }
 0x791   : > { %s6352_s29 = scalar_lea.hbm %s7115_s15, 128 }
 0x792   : > { %p6353_p10 = scmp.ne.s32.totalorder %s7115_s15, %s6352_s29  ;;  %p6358_p13 = scmp.lt.u32.totalorder %s6352_s29, %s7115_s15 }
 0x794   : > { %p6354_p8 = pnand %p6353_p10, %p5237_p3 }
 0x796   : > { %p6355_p7 = pneg %p6354_p8 }
 0x798   : > { %p6360_p2 = pnand %p6358_p13, %p6355_p7 }
 0x79a   : > { %6363 = shalt.err (!%p6360_p2)
}
 0x79b   : > { %5173 = dma.vmem_to_hbm [thread:$0]  (%p5237_p3), %s4367_s17, 128, %s7115_s15, [#allocation5]  }
 0x79c   : > { %6413 = dma.done.wait (%p5237_p3), [#allocation5], 128  }
 0x79d   : > { %6415 = vsyncadd (%p5237_p3), [#allocation5], 4294967168 }
 0x79e PF: > { %p26_p9 = scmp.ge.s32.totalorder %s6796_s27, 7   ;;  %s7116_s21 = smov %s6422_s22 }
 0x79f   : > { %s7117_s22 = smov %s6426_s23  ;;  %s7118_s23 = smov %s6807_s0 }
 0x7a0   : > { %s7119_s24 = smov %s6796_s27  ;;  %28 = sbr.rel (!%p26_p9) target bundleno = 13 (0xd), region = 157 }
 0x7a7   :  { %4379 = vsyncpa [#allocation4], 1 }
 0x7a8   :  { %4381 = vsyncpa [#allocation4 + $0x1], 1 }
 0x7a9   :  { %4382 = vsyncpa [#allocation7], 1 }
 0x7aa   :  { %4383 = vsyncpa [#allocation11], 1 }
 0x7ab   :  { %4384 = vsyncpa [#allocation14], 1 }
 0x7ac   :  { %4385 = vsyncpa [#allocation17], 1 }
 0x7ad   :  { %4386 = vsyncpa [#allocation20], 1 }
 0x7ae   :  { %4387 = vsyncpa [#allocation5], 1 }
 0x7af   :  { %4389 = vsyncpa [#allocation5 + $0x1], 1 }

</bundles_post_ra>
